<compile_context>
chip_gen: v7x
topology: tpu7x:2x2x1
jax: 0.10.0
libtpu: 0.0.40
codegen_flags: <defaults>
</compile_context>

<pallas_src>
import functools

import jax
import jax.numpy as jnp
from jax.experimental import pallas as pl
from jax.experimental.pallas import tpu as pltpu

_SQRT_HALF = 0.7071067811865476


def _layernorm(x, gamma, beta, eps=1e-5):
    mean = jnp.mean(x, axis=-1, keepdims=True)
    var = jnp.mean((x - mean) ** 2, axis=-1, keepdims=True)
    return (x - mean) * jax.lax.rsqrt(var + eps) * gamma + beta


def _gelu(x, approx):
    if approx:
        # tanh approximation -> transcendental lands on the EUP slot (free-ish).
        return jax.nn.gelu(x, approximate=True)
    # torch nn.GELU() default = exact erf form (validation / exact path).
    return 0.5 * x * (1.0 + jax.lax.erf(x * _SQRT_HALF))


def recommender_kernel(act_ref, rep_ref, w_hi_ref, w_lo_ref, vec_ref, b2_ref,
                       out_ref, *, rep_weight, approx_gelu):
    D = out_ref.shape[-1]

    act = act_ref[...]                                   # [TB, 2D] streamed dtype
    rep = rep_ref[...].astype(jnp.float32)               # [TB, 1]
    high = act[:, :D]
    low = act[:, D:]

    vecs = vec_ref[...]                                  # [8, D] f32 stacked rows
    w1r, b1, g1, be1 = vecs[0:1], vecs[1:2], vecs[2:3], vecs[3:4]
    w2, b3, g2, be2 = vecs[4:5], vecs[5:6], vecs[6:7], vecs[7:8]

    # Two wide MXU matmuls (N = 2D).  Columns [:D] feed the fusion network,
    # columns [D:] are the final projection.  Both issue up-front, independent
    # of the VPU/EUP chain below.
    big_hi = jnp.dot(high, w_hi_ref[...], preferred_element_type=jnp.float32)
    big_lo = jnp.dot(low, w_lo_ref[...], preferred_element_type=jnp.float32)

    # fusion_network: Linear(2D+1 -> D) -> LayerNorm -> GELU -> Linear(D,1) -> Sigmoid
    h1 = big_hi[:, :D] + big_lo[:, :D] + rep * w1r + b1
    h1 = _layernorm(h1, g1, be1)
    h1 = _gelu(h1, approx_gelu)
    # Linear(D -> 1) as a lane reduction instead of an N=1 MXU matmul.
    dyn = jnp.sum(h1 * w2, axis=-1, keepdims=True) + b2_ref[0, 0]
    dyn = jax.nn.sigmoid(dyn)                            # [TB, 1]

    # Weighting reassociated onto the projected outputs:
    # rep_w * (high @ W3h) == (rep_w * high) @ W3h for a per-row scalar.
    rep_w = rep_weight + (1.0 - rep_weight) * dyn
    nov_w = 1.0 - rep_w

    # final_projection: Linear(2D -> D) + LayerNorm
    h2 = rep_w * big_hi[:, D:] + nov_w * big_lo[:, D:] + b3
    out_ref[...] = _layernorm(h2, g2, be2).astype(out_ref.dtype)


def _vmem_budget_bytes():
    cap = 64 * 1024 * 1024          # conservative fallback (v7x physical VMEM)
    try:
        cap = int(pltpu.get_tpu_info().vmem_capacity_bytes)
    except Exception:
        pass
    cap = min(max(cap, 32 * 1024 * 1024), 128 * 1024 * 1024)
    return (cap * 3) // 4           # leave ~25% headroom


def _derive_batch_tile(B, D, block_b, act_itemsize, out_itemsize, mxu_itemsize,
                       weight_buffers, vmem_budget):
    # Grid-invariant VMEM: two (D, 2D) weights + the (8, D) vector stack.
    resident = (2 * D * 2 * D * mxu_itemsize + 8 * D * 4) * weight_buffers
    # Per-batch-row VMEM: double-buffered streamed blocks (rep pads to 128 lanes)
    # plus the f32 intermediates (big_hi/big_lo/h1/h2) spilled for large tiles.
    per_row = (2 * (2 * D * act_itemsize) + 2 * 128 * 4 + 2 * D * out_itemsize
               + 7 * D * 4)
    avail = max(vmem_budget - resident, per_row * 8)
    tb = min(block_b, B, max(8, avail // per_row))
    if B > 8:
        # Guarantee >= 2 grid steps so both v7x TensorCores get batch tiles.
        tb = min(tb, max(8, (pl.cdiv(B, 2) // 8) * 8))
    if tb != B:
        tb = max(8, (int(tb) // 8) * 8)
    return int(tb)


def unified_recommender(high, low, rep, params, rep_weight=0.7,
                        block_b=1024, use_bf16=True, out_dtype=None,
                        gelu_approx=None, single_buffer_weights=True):
    B, D = high.shape
    if out_dtype is None:
        out_dtype = jnp.bfloat16 if use_bf16 else jnp.float32
    if gelu_approx is None:
        gelu_approx = use_bf16
    act_dtype = jnp.bfloat16 if use_bf16 else jnp.float32
    mxu_dt = jnp.bfloat16 if use_bf16 else jnp.float32

    # Wrapper-side prep (one fused XLA op each; cache these in production):
    act = jnp.concatenate([high, low], axis=1).astype(act_dtype)           # (B, 2D)
    rep = rep.astype(jnp.float32)                                          # (B, 1)
    w_hi = jnp.concatenate([params["w1h"], params["w3h"]], axis=1).astype(mxu_dt)
    w_lo = jnp.concatenate([params["w1l"], params["w3l"]], axis=1).astype(mxu_dt)
    vecs = jnp.concatenate([params["w1r"], params["b1"], params["g1"],
                            params["be1"], params["w2"], params["b3"],
                            params["g2"], params["be2"]],
                           axis=0).astype(jnp.float32)                     # (8, D)
    b2 = params["b2"].astype(jnp.float32).reshape(1, 1)

    vmem_budget = _vmem_budget_bytes()
    wbuf = 1 if single_buffer_weights else 2
    tb = _derive_batch_tile(B, D, block_b,
                            jnp.dtype(act_dtype).itemsize,
                            jnp.dtype(out_dtype).itemsize,
                            jnp.dtype(mxu_dt).itemsize,
                            wbuf, vmem_budget)
    grid = (pl.cdiv(B, tb),)

    kernel = functools.partial(recommender_kernel,
                               rep_weight=float(rep_weight),
                               approx_gelu=bool(gelu_approx))
    args = (act, rep, w_hi, w_lo, vecs, b2)

    def build(weight_mode):
        def wspec(shape):
            if weight_mode is None:
                return pl.BlockSpec(shape, lambda i: (0, 0))
            return pl.BlockSpec(shape, lambda i: (0, 0), pipeline_mode=weight_mode)

        in_specs = [
            pl.BlockSpec((tb, 2 * D), lambda i: (i, 0)),        # merged high|low
            pl.BlockSpec((tb, 1), lambda i: (i, 0)),            # repetition scores
            wspec((D, 2 * D)),                                  # [w1h | w3h]
            wspec((D, 2 * D)),                                  # [w1l | w3l]
            wspec((8, D)),                                      # stacked row vectors
            pl.BlockSpec(memory_space=pltpu.MemorySpace.SMEM),  # b2 scalar
        ]
        return pl.pallas_call(
            kernel,
            out_shape=jax.ShapeDtypeStruct((B, D), out_dtype),
            grid=grid,
            in_specs=in_specs,
            out_specs=pl.BlockSpec((tb, D), lambda i: (i, 0)),
            compiler_params=pltpu.CompilerParams(
                dimension_semantics=("parallel",),
                vmem_limit_bytes=int(vmem_budget),
            ),
        )

    # Prefer single-buffered grid-invariant weights (halves their VMEM);
    # fall back to default double-buffering if Buffered(1) is not supported.
    modes = [pl.Buffered(1), None] if single_buffer_weights else [None]
    err = None
    for mode in modes:
        try:
            return build(mode)(*args)
        except Exception as e:      # pragma: no cover - buffering-mode fallback
            err = e
    raise err


def init_params(key, D):
    ks = jax.random.split(key, 12)
    s = 0.05
    # fusion_network Linear1: torch weight [D, 2D+1]; stored transposed and split.
    w1h = jax.random.normal(ks[0], (D, D), jnp.float32) * s
    w1l = jax.random.normal(ks[1], (D, D), jnp.float32) * s
    w1r = jax.random.normal(ks[2], (1, D), jnp.float32) * s
    b1 = jax.random.normal(ks[3], (1, D), jnp.float32) * s
    g1 = jnp.ones((1, D), jnp.float32)
    be1 = jnp.zeros((1, D), jnp.float32)
    # fusion_network Linear2: torch weight [1, D]; stored as a lane-dense row.
    w2 = jax.random.normal(ks[4], (1, D), jnp.float32) * s
    b2 = jax.random.normal(ks[5], (1, 1), jnp.float32) * s
    # final_projection Linear: torch weight [D, 2D]; stored transposed and split.
    w3h = jax.random.normal(ks[6], (D, D), jnp.float32) * s
    w3l = jax.random.normal(ks[7], (D, D), jnp.float32) * s
    b3 = jax.random.normal(ks[8], (1, D), jnp.float32) * s
    g2 = jnp.ones((1, D), jnp.float32)
    be2 = jnp.zeros((1, D), jnp.float32)
    return dict(w1h=w1h, w1l=w1l, w1r=w1r, b1=b1, g1=g1, be1=be1,
                w2=w2, b2=b2, w3h=w3h, w3l=w3l, b3=b3, g2=g2, be2=be2)


def reference(high, low, rep, p, rep_weight=0.7):
    # Pure-JAX f32 reference mirroring the PyTorch module exactly (erf GELU).
    fusion_in = jnp.concatenate([high, low, rep], axis=1)
    W1 = jnp.concatenate([p["w1h"], p["w1l"], p["w1r"]], axis=0)   # [2D+1, D]
    h1 = fusion_in @ W1 + p["b1"]
    h1 = _layernorm(h1, p["g1"], p["be1"])
    h1 = _gelu(h1, approx=False)
    dyn = jax.nn.sigmoid(h1 @ p["w2"].T + p["b2"])
    rw = rep_weight + (1 - rep_weight) * dyn
    nw = 1 - rw
    cat = jnp.concatenate([rw * high, nw * low], axis=1)
    W3 = jnp.concatenate([p["w3h"], p["w3l"]], axis=0)             # [2D, D]
    h2 = cat @ W3 + p["b3"]
    return _layernorm(h2, p["g2"], p["be2"])


if __name__ == "__main__":
    # Small but lane-dense shapes: D = 128 (one full lane width), B = 64.
    B, D = 64, 128
    key = jax.random.PRNGKey(0)
    k1, k2, k3, kp = jax.random.split(key, 4)
    high = jax.random.normal(k1, (B, D), jnp.float32)
    low = jax.random.normal(k2, (B, D), jnp.float32)
    rep = jax.nn.sigmoid(jax.random.normal(k3, (B, 1), jnp.float32))
    params = init_params(kp, D)

    ref = reference(high, low, rep, params, rep_weight=0.7)

    # 1) Exact path (f32 streaming, f32 MXU, erf GELU): tight semantics check.
    out_f32 = unified_recommender(high, low, rep, params, rep_weight=0.7,
                                  block_b=16, use_bf16=False)
    out_f32 = jax.block_until_ready(out_f32)
    assert out_f32.shape == (B, D) and out_f32.dtype == jnp.float32
    assert jnp.allclose(out_f32, ref, atol=1e-4, rtol=1e-4), "f32 path mismatch"

    # 2) Exact path with a ragged last tile (tb=24 -> grid of 3, last block partial).
    out_rag = unified_recommender(high, low, rep, params, rep_weight=0.7,
                                  block_b=24, use_bf16=False)
    out_rag = jax.block_until_ready(out_rag)
    assert jnp.allclose(out_rag, ref, atol=1e-4, rtol=1e-4), "ragged-tile mismatch"

    # 3) Fast path (bf16 streamed activations/weights/output, tanh GELU):
    #    loose sanity check — intentional accuracy/bandwidth tradeoff.
    out_fast = unified_recommender(high, low, rep, params, rep_weight=0.7,
                                   use_bf16=True)
    out_fast = jax.block_until_ready(out_fast)
    assert out_fast.shape == (B, D) and out_fast.dtype == jnp.bfloat16
    assert jnp.allclose(out_fast.astype(jnp.float32), ref,
                        atol=1.5e-1, rtol=1.5e-1), "bf16 fast path mismatch"

    print("KERNEL_OK")
</pallas_src>

<mosaic_0001>
module attributes {stable_mosaic.version = 11 : i64} {
  func.func @recommender_kernel(%arg0: i32, %arg1: memref<16x256xf32, #tpu.memory_space<vmem>>, %arg2: memref<16x1xf32, #tpu.memory_space<vmem>>, %arg3: memref<128x256xf32, #tpu.memory_space<vmem>>, %arg4: memref<128x256xf32, #tpu.memory_space<vmem>>, %arg5: memref<8x128xf32, #tpu.memory_space<vmem>>, %arg6: memref<1x1xf32, #tpu.memory_space<smem>>, %arg7: memref<16x128xf32, #tpu.memory_space<vmem>>) attributes {dimension_semantics = [#tpu.dimension_semantics<parallel>], iteration_bounds = array<i64: 4>, scalar_prefetch = 0 : i64, scratch_operands = 0 : i64, tpu.core_type = #tpu.core_type<tc>, window_params = [{transform_indices = @transform_0, window_bounds = array<i64: 16, 256>}, {transform_indices = @transform_1, window_bounds = array<i64: 16, 1>}, {pipeline_mode = #tpu.pipeline_mode<synchronous>, transform_indices = @transform_2, window_bounds = array<i64: 128, 256>}, {pipeline_mode = #tpu.pipeline_mode<synchronous>, transform_indices = @transform_3, window_bounds = array<i64: 128, 256>}, {pipeline_mode = #tpu.pipeline_mode<synchronous>, transform_indices = @transform_4, window_bounds = array<i64: 8, 128>}, {transform_indices = @transform_5, window_bounds = array<i64: 1, 1>}, {transform_indices = @transform_6, window_bounds = array<i64: 16, 128>}]} {
    %c0 = arith.constant 0 : index
    %c0_0 = arith.constant 0 : index
    %0 = vector.load %arg1[%c0, %c0_0] : memref<16x256xf32, #tpu.memory_space<vmem>>, vector<16x256xf32>
    %c0_1 = arith.constant 0 : index
    %c0_2 = arith.constant 0 : index
    %1 = vector.load %arg2[%c0_1, %c0_2] : memref<16x1xf32, #tpu.memory_space<vmem>>, vector<16x1xf32>
    %2 = vector.extract_strided_slice %0 {offsets = [0, 0], sizes = [16, 128], strides = [1, 1]} : vector<16x256xf32> to vector<16x128xf32>
    %3 = vector.extract_strided_slice %0 {offsets = [0, 128], sizes = [16, 128], strides = [1, 1]} : vector<16x256xf32> to vector<16x128xf32>
    %c0_3 = arith.constant 0 : index
    %c0_4 = arith.constant 0 : index
    %4 = vector.load %arg5[%c0_3, %c0_4] : memref<8x128xf32, #tpu.memory_space<vmem>>, vector<8x128xf32>
    %5 = vector.extract_strided_slice %4 {offsets = [0, 0], sizes = [1, 128], strides = [1, 1]} : vector<8x128xf32> to vector<1x128xf32>
    %6 = vector.extract_strided_slice %4 {offsets = [1, 0], sizes = [1, 128], strides = [1, 1]} : vector<8x128xf32> to vector<1x128xf32>
    %7 = vector.extract_strided_slice %4 {offsets = [2, 0], sizes = [1, 128], strides = [1, 1]} : vector<8x128xf32> to vector<1x128xf32>
    %8 = vector.extract_strided_slice %4 {offsets = [3, 0], sizes = [1, 128], strides = [1, 1]} : vector<8x128xf32> to vector<1x128xf32>
    %9 = vector.extract_strided_slice %4 {offsets = [4, 0], sizes = [1, 128], strides = [1, 1]} : vector<8x128xf32> to vector<1x128xf32>
    %10 = vector.extract_strided_slice %4 {offsets = [5, 0], sizes = [1, 128], strides = [1, 1]} : vector<8x128xf32> to vector<1x128xf32>
    %11 = vector.extract_strided_slice %4 {offsets = [6, 0], sizes = [1, 128], strides = [1, 1]} : vector<8x128xf32> to vector<1x128xf32>
    %12 = vector.extract_strided_slice %4 {offsets = [7, 0], sizes = [1, 128], strides = [1, 1]} : vector<8x128xf32> to vector<1x128xf32>
    %c0_5 = arith.constant 0 : index
    %c0_6 = arith.constant 0 : index
    %13 = vector.load %arg3[%c0_5, %c0_6] : memref<128x256xf32, #tpu.memory_space<vmem>>, vector<128x256xf32>
    %cst = arith.constant dense<0.000000e+00> : vector<16x256xf32>
    %14 = tpu.matmul %2, %13, %cst {dimension_numbers = #tpu.dot_dimension_numbers<[1], [0], [0], [1], [0, 0, 1, 1], [], []>} : vector<16x128xf32>, vector<128x256xf32>, vector<16x256xf32> -> vector<16x256xf32>
    %c0_7 = arith.constant 0 : index
    %c0_8 = arith.constant 0 : index
    %15 = vector.load %arg4[%c0_7, %c0_8] : memref<128x256xf32, #tpu.memory_space<vmem>>, vector<128x256xf32>
    %cst_9 = arith.constant dense<0.000000e+00> : vector<16x256xf32>
    %16 = tpu.matmul %3, %15, %cst_9 {dimension_numbers = #tpu.dot_dimension_numbers<[1], [0], [0], [1], [0, 0, 1, 1], [], []>} : vector<16x128xf32>, vector<128x256xf32>, vector<16x256xf32> -> vector<16x256xf32>
    %17 = vector.extract_strided_slice %14 {offsets = [0, 0], sizes = [16, 128], strides = [1, 1]} : vector<16x256xf32> to vector<16x128xf32>
    %18 = vector.extract_strided_slice %16 {offsets = [0, 0], sizes = [16, 128], strides = [1, 1]} : vector<16x256xf32> to vector<16x128xf32>
    %19 = arith.addf %17, %18 : vector<16x128xf32>
    %20 = vector.broadcast %1 : vector<16x1xf32> to vector<16x128xf32>
    %21 = vector.broadcast %5 : vector<1x128xf32> to vector<16x128xf32>
    %22 = arith.mulf %20, %21 : vector<16x128xf32>
    %23 = arith.addf %19, %22 : vector<16x128xf32>
    %24 = vector.broadcast %6 : vector<1x128xf32> to vector<16x128xf32>
    %25 = arith.addf %23, %24 : vector<16x128xf32>
    %cst_10 = arith.constant dense<0.000000e+00> : vector<16xf32>
    %26 = vector.multi_reduction <add>, %25, %cst_10 [1] : vector<16x128xf32> to vector<16xf32>
    %27 = vector.shape_cast %26 : vector<16xf32> to vector<16x1xf32>
    %cst_11 = arith.constant 1.280000e+02 : f32
    %28 = vector.broadcast %cst_11 : f32 to vector<16x1xf32>
    %29 = arith.divf %27, %28 : vector<16x1xf32>
    %30 = vector.broadcast %29 : vector<16x1xf32> to vector<16x128xf32>
    %31 = arith.subf %25, %30 : vector<16x128xf32>
    %32 = arith.mulf %31, %31 : vector<16x128xf32>
    %cst_12 = arith.constant dense<0.000000e+00> : vector<16xf32>
    %33 = vector.multi_reduction <add>, %32, %cst_12 [1] : vector<16x128xf32> to vector<16xf32>
    %34 = vector.shape_cast %33 : vector<16xf32> to vector<16x1xf32>
    %cst_13 = arith.constant 1.280000e+02 : f32
    %35 = vector.broadcast %cst_13 : f32 to vector<16x1xf32>
    %36 = arith.divf %34, %35 : vector<16x1xf32>
    %37 = vector.broadcast %29 : vector<16x1xf32> to vector<16x128xf32>
    %38 = arith.subf %25, %37 : vector<16x128xf32>
    %cst_14 = arith.constant 9.99999974E-6 : f32
    %39 = vector.broadcast %cst_14 : f32 to vector<16x1xf32>
    %40 = arith.addf %36, %39 : vector<16x1xf32>
    %41 = math.rsqrt %40 : vector<16x1xf32>
    %42 = vector.broadcast %41 : vector<16x1xf32> to vector<16x128xf32>
    %43 = arith.mulf %38, %42 : vector<16x128xf32>
    %44 = vector.broadcast %7 : vector<1x128xf32> to vector<16x128xf32>
    %45 = arith.mulf %43, %44 : vector<16x128xf32>
    %46 = vector.broadcast %8 : vector<1x128xf32> to vector<16x128xf32>
    %47 = arith.addf %45, %46 : vector<16x128xf32>
    %cst_15 = arith.constant 5.000000e-01 : f32
    %48 = vector.broadcast %cst_15 : f32 to vector<16x128xf32>
    %49 = arith.mulf %48, %47 : vector<16x128xf32>
    %cst_16 = arith.constant 0.707106769 : f32
    %50 = vector.broadcast %cst_16 : f32 to vector<16x128xf32>
    %51 = arith.mulf %47, %50 : vector<16x128xf32>
    %52 = math.erf %51 : vector<16x128xf32>
    %cst_17 = arith.constant 1.000000e+00 : f32
    %53 = vector.broadcast %cst_17 : f32 to vector<16x128xf32>
    %54 = arith.addf %53, %52 : vector<16x128xf32>
    %55 = arith.mulf %49, %54 : vector<16x128xf32>
    %56 = vector.broadcast %9 : vector<1x128xf32> to vector<16x128xf32>
    %57 = arith.mulf %55, %56 : vector<16x128xf32>
    %cst_18 = arith.constant dense<0.000000e+00> : vector<16xf32>
    %58 = vector.multi_reduction <add>, %57, %cst_18 [1] : vector<16x128xf32> to vector<16xf32>
    %59 = vector.shape_cast %58 : vector<16xf32> to vector<16x1xf32>
    %c0_19 = arith.constant 0 : index
    %c0_20 = arith.constant 0 : index
    %60 = memref.load %arg6[%c0_19, %c0_20] : memref<1x1xf32, #tpu.memory_space<smem>>
    %61 = vector.broadcast %60 : f32 to vector<16x1xf32>
    %62 = arith.addf %59, %61 : vector<16x1xf32>
    %63 = arith.negf %62 : vector<16x1xf32>
    %64 = math.exp %63 : vector<16x1xf32>
    %cst_21 = arith.constant 1.000000e+00 : f32
    %65 = vector.broadcast %cst_21 : f32 to vector<16x1xf32>
    %66 = arith.addf %65, %64 : vector<16x1xf32>
    %67 = arith.divf %65, %66 : vector<16x1xf32>
    %cst_22 = arith.constant 3.000000e-01 : f32
    %68 = vector.broadcast %cst_22 : f32 to vector<16x1xf32>
    %69 = arith.mulf %68, %67 : vector<16x1xf32>
    %cst_23 = arith.constant 0.699999988 : f32
    %70 = vector.broadcast %cst_23 : f32 to vector<16x1xf32>
    %71 = arith.addf %70, %69 : vector<16x1xf32>
    %cst_24 = arith.constant 1.000000e+00 : f32
    %72 = vector.broadcast %cst_24 : f32 to vector<16x1xf32>
    %73 = arith.subf %72, %71 : vector<16x1xf32>
    %74 = vector.extract_strided_slice %14 {offsets = [0, 128], sizes = [16, 128], strides = [1, 1]} : vector<16x256xf32> to vector<16x128xf32>
    %75 = vector.broadcast %71 : vector<16x1xf32> to vector<16x128xf32>
    %76 = arith.mulf %75, %74 : vector<16x128xf32>
    %77 = vector.extract_strided_slice %16 {offsets = [0, 128], sizes = [16, 128], strides = [1, 1]} : vector<16x256xf32> to vector<16x128xf32>
    %78 = vector.broadcast %73 : vector<16x1xf32> to vector<16x128xf32>
    %79 = arith.mulf %78, %77 : vector<16x128xf32>
    %80 = arith.addf %76, %79 : vector<16x128xf32>
    %81 = vector.broadcast %10 : vector<1x128xf32> to vector<16x128xf32>
    %82 = arith.addf %80, %81 : vector<16x128xf32>
    %cst_25 = arith.constant dense<0.000000e+00> : vector<16xf32>
    %83 = vector.multi_reduction <add>, %82, %cst_25 [1] : vector<16x128xf32> to vector<16xf32>
    %84 = vector.shape_cast %83 : vector<16xf32> to vector<16x1xf32>
    %cst_26 = arith.constant 1.280000e+02 : f32
    %85 = vector.broadcast %cst_26 : f32 to vector<16x1xf32>
    %86 = arith.divf %84, %85 : vector<16x1xf32>
    %87 = vector.broadcast %86 : vector<16x1xf32> to vector<16x128xf32>
    %88 = arith.subf %82, %87 : vector<16x128xf32>
    %89 = arith.mulf %88, %88 : vector<16x128xf32>
    %cst_27 = arith.constant dense<0.000000e+00> : vector<16xf32>
    %90 = vector.multi_reduction <add>, %89, %cst_27 [1] : vector<16x128xf32> to vector<16xf32>
    %91 = vector.shape_cast %90 : vector<16xf32> to vector<16x1xf32>
    %cst_28 = arith.constant 1.280000e+02 : f32
    %92 = vector.broadcast %cst_28 : f32 to vector<16x1xf32>
    %93 = arith.divf %91, %92 : vector<16x1xf32>
    %94 = vector.broadcast %86 : vector<16x1xf32> to vector<16x128xf32>
    %95 = arith.subf %82, %94 : vector<16x128xf32>
    %cst_29 = arith.constant 9.99999974E-6 : f32
    %96 = vector.broadcast %cst_29 : f32 to vector<16x1xf32>
    %97 = arith.addf %93, %96 : vector<16x1xf32>
    %98 = math.rsqrt %97 : vector<16x1xf32>
    %99 = vector.broadcast %98 : vector<16x1xf32> to vector<16x128xf32>
    %100 = arith.mulf %95, %99 : vector<16x128xf32>
    %101 = vector.broadcast %11 : vector<1x128xf32> to vector<16x128xf32>
    %102 = arith.mulf %100, %101 : vector<16x128xf32>
    %103 = vector.broadcast %12 : vector<1x128xf32> to vector<16x128xf32>
    %104 = arith.addf %102, %103 : vector<16x128xf32>
    %c0_30 = arith.constant 0 : index
    %c0_31 = arith.constant 0 : index
    %105 = vector.load %arg7[%c0_30, %c0_31] : memref<16x128xf32, #tpu.memory_space<vmem>>, vector<16x128xf32>
    tpu.vector_store %arg7[%c0_30, %c0_31], %104 {strides = array<i32>} : memref<16x128xf32, #tpu.memory_space<vmem>>, vector<16x128xf32>,
    return
  }
  func.func @transform_0(%arg0: i32) -> (i32, i32) {
    %c0_i32 = arith.constant 0 : i32
    %c0_i32_0 = arith.constant 0 : i32
    return %arg0, %c0_i32 : i32, i32
  }
  func.func @transform_1(%arg0: i32) -> (i32, i32) {
    %c0_i32 = arith.constant 0 : i32
    %c0_i32_0 = arith.constant 0 : i32
    return %arg0, %c0_i32 : i32, i32
  }
  func.func @transform_2(%arg0: i32) -> (i32, i32) {
    %c0_i32 = arith.constant 0 : i32
    %c0_i32_0 = arith.constant 0 : i32
    %c0_i32_1 = arith.constant 0 : i32
    return %c0_i32, %c0_i32_0 : i32, i32
  }
  func.func @transform_3(%arg0: i32) -> (i32, i32) {
    %c0_i32 = arith.constant 0 : i32
    %c0_i32_0 = arith.constant 0 : i32
    %c0_i32_1 = arith.constant 0 : i32
    return %c0_i32, %c0_i32_0 : i32, i32
  }
  func.func @transform_4(%arg0: i32) -> (i32, i32) {
    %c0_i32 = arith.constant 0 : i32
    %c0_i32_0 = arith.constant 0 : i32
    %c0_i32_1 = arith.constant 0 : i32
    return %c0_i32, %c0_i32_0 : i32, i32
  }
  func.func @transform_5(%arg0: i32) -> (i32, i32) {
    %c0_i32 = arith.constant 0 : i32
    %c0_i32_0 = arith.constant 0 : i32
    %c0_i32_1 = arith.constant 0 : i32
    return %c0_i32, %c0_i32_0 : i32, i32
  }
  func.func @transform_6(%arg0: i32) -> (i32, i32) {
    %c0_i32 = arith.constant 0 : i32
    %c0_i32_0 = arith.constant 0 : i32
    return %arg0, %c0_i32 : i32, i32
  }
}

module attributes {stable_mosaic.version = 11 : i64} {
  func.func @recommender_kernel(%arg0: i32, %arg1: memref<16x256xf32, #tpu.memory_space<vmem>>, %arg2: memref<16x1xf32, #tpu.memory_space<vmem>>, %arg3: memref<128x256xf32, #tpu.memory_space<vmem>>, %arg4: memref<128x256xf32, #tpu.memory_space<vmem>>, %arg5: memref<8x128xf32, #tpu.memory_space<vmem>>, %arg6: memref<1x1xf32, #tpu.memory_space<smem>>, %arg7: memref<16x128xf32, #tpu.memory_space<vmem>>) attributes {dimension_semantics = [#tpu.dimension_semantics<parallel>], iteration_bounds = array<i64: 4>, scalar_prefetch = 0 : i64, scratch_operands = 0 : i64, tpu.core_type = #tpu.core_type<tc>, window_params = [{transform_indices = @transform_0, window_bounds = array<i64: 16, 256>}, {transform_indices = @transform_1, window_bounds = array<i64: 16, 1>}, {pipeline_mode = #tpu.pipeline_mode<synchronous>, transform_indices = @transform_2, window_bounds = array<i64: 128, 256>}, {pipeline_mode = #tpu.pipeline_mode<synchronous>, transform_indices = @transform_3, window_bounds = array<i64: 128, 256>}, {pipeline_mode = #tpu.pipeline_mode<synchronous>, transform_indices = @transform_4, window_bounds = array<i64: 8, 128>}, {transform_indices = @transform_5, window_bounds = array<i64: 1, 1>}, {transform_indices = @transform_6, window_bounds = array<i64: 16, 128>}]} {
    %c0 = arith.constant 0 : index
    %c0_0 = arith.constant 0 : index
    %0 = vector.load %arg1[%c0, %c0_0] : memref<16x256xf32, #tpu.memory_space<vmem>>, vector<16x256xf32>
    %c0_1 = arith.constant 0 : index
    %c0_2 = arith.constant 0 : index
    %1 = vector.load %arg2[%c0_1, %c0_2] : memref<16x1xf32, #tpu.memory_space<vmem>>, vector<16x1xf32>
    %2 = vector.extract_strided_slice %0 {offsets = [0, 0], sizes = [16, 128], strides = [1, 1]} : vector<16x256xf32> to vector<16x128xf32>
    %3 = vector.extract_strided_slice %0 {offsets = [0, 128], sizes = [16, 128], strides = [1, 1]} : vector<16x256xf32> to vector<16x128xf32>
    %c0_3 = arith.constant 0 : index
    %c0_4 = arith.constant 0 : index
    %4 = vector.load %arg5[%c0_3, %c0_4] : memref<8x128xf32, #tpu.memory_space<vmem>>, vector<8x128xf32>
    %5 = vector.extract_strided_slice %4 {offsets = [0, 0], sizes = [1, 128], strides = [1, 1]} : vector<8x128xf32> to vector<1x128xf32>
    %6 = vector.extract_strided_slice %4 {offsets = [1, 0], sizes = [1, 128], strides = [1, 1]} : vector<8x128xf32> to vector<1x128xf32>
    %7 = vector.extract_strided_slice %4 {offsets = [2, 0], sizes = [1, 128], strides = [1, 1]} : vector<8x128xf32> to vector<1x128xf32>
    %8 = vector.extract_strided_slice %4 {offsets = [3, 0], sizes = [1, 128], strides = [1, 1]} : vector<8x128xf32> to vector<1x128xf32>
    %9 = vector.extract_strided_slice %4 {offsets = [4, 0], sizes = [1, 128], strides = [1, 1]} : vector<8x128xf32> to vector<1x128xf32>
    %10 = vector.extract_strided_slice %4 {offsets = [5, 0], sizes = [1, 128], strides = [1, 1]} : vector<8x128xf32> to vector<1x128xf32>
    %11 = vector.extract_strided_slice %4 {offsets = [6, 0], sizes = [1, 128], strides = [1, 1]} : vector<8x128xf32> to vector<1x128xf32>
    %12 = vector.extract_strided_slice %4 {offsets = [7, 0], sizes = [1, 128], strides = [1, 1]} : vector<8x128xf32> to vector<1x128xf32>
    %c0_5 = arith.constant 0 : index
    %c0_6 = arith.constant 0 : index
    %13 = vector.load %arg3[%c0_5, %c0_6] : memref<128x256xf32, #tpu.memory_space<vmem>>, vector<128x256xf32>
    %cst = arith.constant dense<0.000000e+00> : vector<16x256xf32>
    %14 = tpu.matmul %2, %13, %cst {dimension_numbers = #tpu.dot_dimension_numbers<[1], [0], [0], [1], [0, 0, 1, 1], [], []>} : vector<16x128xf32>, vector<128x256xf32>, vector<16x256xf32> -> vector<16x256xf32>
    %c0_7 = arith.constant 0 : index
    %c0_8 = arith.constant 0 : index
    %15 = vector.load %arg4[%c0_7, %c0_8] : memref<128x256xf32, #tpu.memory_space<vmem>>, vector<128x256xf32>
    %cst_9 = arith.constant dense<0.000000e+00> : vector<16x256xf32>
    %16 = tpu.matmul %3, %15, %cst_9 {dimension_numbers = #tpu.dot_dimension_numbers<[1], [0], [0], [1], [0, 0, 1, 1], [], []>} : vector<16x128xf32>, vector<128x256xf32>, vector<16x256xf32> -> vector<16x256xf32>
    %17 = vector.extract_strided_slice %14 {offsets = [0, 0], sizes = [16, 128], strides = [1, 1]} : vector<16x256xf32> to vector<16x128xf32>
    %18 = vector.extract_strided_slice %16 {offsets = [0, 0], sizes = [16, 128], strides = [1, 1]} : vector<16x256xf32> to vector<16x128xf32>
    %19 = arith.addf %17, %18 : vector<16x128xf32>
    %20 = vector.broadcast %1 : vector<16x1xf32> to vector<16x128xf32>
    %21 = vector.broadcast %5 : vector<1x128xf32> to vector<16x128xf32>
    %22 = arith.mulf %20, %21 : vector<16x128xf32>
    %23 = arith.addf %19, %22 : vector<16x128xf32>
    %24 = vector.broadcast %6 : vector<1x128xf32> to vector<16x128xf32>
    %25 = arith.addf %23, %24 : vector<16x128xf32>
    %cst_10 = arith.constant dense<0.000000e+00> : vector<16xf32>
    %26 = vector.multi_reduction <add>, %25, %cst_10 [1] : vector<16x128xf32> to vector<16xf32>
    %27 = vector.shape_cast %26 : vector<16xf32> to vector<16x1xf32>
    %cst_11 = arith.constant 1.280000e+02 : f32
    %28 = vector.broadcast %cst_11 : f32 to vector<16x1xf32>
    %29 = arith.divf %27, %28 : vector<16x1xf32>
    %30 = vector.broadcast %29 : vector<16x1xf32> to vector<16x128xf32>
    %31 = arith.subf %25, %30 : vector<16x128xf32>
    %32 = arith.mulf %31, %31 : vector<16x128xf32>
    %cst_12 = arith.constant dense<0.000000e+00> : vector<16xf32>
    %33 = vector.multi_reduction <add>, %32, %cst_12 [1] : vector<16x128xf32> to vector<16xf32>
    %34 = vector.shape_cast %33 : vector<16xf32> to vector<16x1xf32>
    %cst_13 = arith.constant 1.280000e+02 : f32
    %35 = vector.broadcast %cst_13 : f32 to vector<16x1xf32>
    %36 = arith.divf %34, %35 : vector<16x1xf32>
    %37 = vector.broadcast %29 : vector<16x1xf32> to vector<16x128xf32>
    %38 = arith.subf %25, %37 : vector<16x128xf32>
    %cst_14 = arith.constant 9.99999974E-6 : f32
    %39 = vector.broadcast %cst_14 : f32 to vector<16x1xf32>
    %40 = arith.addf %36, %39 : vector<16x1xf32>
    %41 = math.rsqrt %40 : vector<16x1xf32>
    %42 = vector.broadcast %41 : vector<16x1xf32> to vector<16x128xf32>
    %43 = arith.mulf %38, %42 : vector<16x128xf32>
    %44 = vector.broadcast %7 : vector<1x128xf32> to vector<16x128xf32>
    %45 = arith.mulf %43, %44 : vector<16x128xf32>
    %46 = vector.broadcast %8 : vector<1x128xf32> to vector<16x128xf32>
    %47 = arith.addf %45, %46 : vector<16x128xf32>
    %cst_15 = arith.constant 5.000000e-01 : f32
    %48 = vector.broadcast %cst_15 : f32 to vector<16x128xf32>
    %49 = arith.mulf %48, %47 : vector<16x128xf32>
    %cst_16 = arith.constant 0.707106769 : f32
    %50 = vector.broadcast %cst_16 : f32 to vector<16x128xf32>
    %51 = arith.mulf %47, %50 : vector<16x128xf32>
    %52 = math.erf %51 : vector<16x128xf32>
    %cst_17 = arith.constant 1.000000e+00 : f32
    %53 = vector.broadcast %cst_17 : f32 to vector<16x128xf32>
    %54 = arith.addf %53, %52 : vector<16x128xf32>
    %55 = arith.mulf %49, %54 : vector<16x128xf32>
    %56 = vector.broadcast %9 : vector<1x128xf32> to vector<16x128xf32>
    %57 = arith.mulf %55, %56 : vector<16x128xf32>
    %cst_18 = arith.constant dense<0.000000e+00> : vector<16xf32>
    %58 = vector.multi_reduction <add>, %57, %cst_18 [1] : vector<16x128xf32> to vector<16xf32>
    %59 = vector.shape_cast %58 : vector<16xf32> to vector<16x1xf32>
    %c0_19 = arith.constant 0 : index
    %c0_20 = arith.constant 0 : index
    %60 = memref.load %arg6[%c0_19, %c0_20] : memref<1x1xf32, #tpu.memory_space<smem>>
    %61 = vector.broadcast %60 : f32 to vector<16x1xf32>
    %62 = arith.addf %59, %61 : vector<16x1xf32>
    %63 = arith.negf %62 : vector<16x1xf32>
    %64 = math.exp %63 : vector<16x1xf32>
    %cst_21 = arith.constant 1.000000e+00 : f32
    %65 = vector.broadcast %cst_21 : f32 to vector<16x1xf32>
    %66 = arith.addf %65, %64 : vector<16x1xf32>
    %67 = arith.divf %65, %66 : vector<16x1xf32>
    %cst_22 = arith.constant 3.000000e-01 : f32
    %68 = vector.broadcast %cst_22 : f32 to vector<16x1xf32>
    %69 = arith.mulf %68, %67 : vector<16x1xf32>
    %cst_23 = arith.constant 0.699999988 : f32
    %70 = vector.broadcast %cst_23 : f32 to vector<16x1xf32>
    %71 = arith.addf %70, %69 : vector<16x1xf32>
    %cst_24 = arith.constant 1.000000e+00 : f32
    %72 = vector.broadcast %cst_24 : f32 to vector<16x1xf32>
    %73 = arith.subf %72, %71 : vector<16x1xf32>
    %74 = vector.extract_strided_slice %14 {offsets = [0, 128], sizes = [16, 128], strides = [1, 1]} : vector<16x256xf32> to vector<16x128xf32>
    %75 = vector.broadcast %71 : vector<16x1xf32> to vector<16x128xf32>
    %76 = arith.mulf %75, %74 : vector<16x128xf32>
    %77 = vector.extract_strided_slice %16 {offsets = [0, 128], sizes = [16, 128], strides = [1, 1]} : vector<16x256xf32> to vector<16x128xf32>
    %78 = vector.broadcast %73 : vector<16x1xf32> to vector<16x128xf32>
    %79 = arith.mulf %78, %77 : vector<16x128xf32>
    %80 = arith.addf %76, %79 : vector<16x128xf32>
    %81 = vector.broadcast %10 : vector<1x128xf32> to vector<16x128xf32>
    %82 = arith.addf %80, %81 : vector<16x128xf32>
    %cst_25 = arith.constant dense<0.000000e+00> : vector<16xf32>
    %83 = vector.multi_reduction <add>, %82, %cst_25 [1] : vector<16x128xf32> to vector<16xf32>
    %84 = vector.shape_cast %83 : vector<16xf32> to vector<16x1xf32>
    %cst_26 = arith.constant 1.280000e+02 : f32
    %85 = vector.broadcast %cst_26 : f32 to vector<16x1xf32>
    %86 = arith.divf %84, %85 : vector<16x1xf32>
    %87 = vector.broadcast %86 : vector<16x1xf32> to vector<16x128xf32>
    %88 = arith.subf %82, %87 : vector<16x128xf32>
    %89 = arith.mulf %88, %88 : vector<16x128xf32>
    %cst_27 = arith.constant dense<0.000000e+00> : vector<16xf32>
    %90 = vector.multi_reduction <add>, %89, %cst_27 [1] : vector<16x128xf32> to vector<16xf32>
    %91 = vector.shape_cast %90 : vector<16xf32> to vector<16x1xf32>
    %cst_28 = arith.constant 1.280000e+02 : f32
    %92 = vector.broadcast %cst_28 : f32 to vector<16x1xf32>
    %93 = arith.divf %91, %92 : vector<16x1xf32>
    %94 = vector.broadcast %86 : vector<16x1xf32> to vector<16x128xf32>
    %95 = arith.subf %82, %94 : vector<16x128xf32>
    %cst_29 = arith.constant 9.99999974E-6 : f32
    %96 = vector.broadcast %cst_29 : f32 to vector<16x1xf32>
    %97 = arith.addf %93, %96 : vector<16x1xf32>
    %98 = math.rsqrt %97 : vector<16x1xf32>
    %99 = vector.broadcast %98 : vector<16x1xf32> to vector<16x128xf32>
    %100 = arith.mulf %95, %99 : vector<16x128xf32>
    %101 = vector.broadcast %11 : vector<1x128xf32> to vector<16x128xf32>
    %102 = arith.mulf %100, %101 : vector<16x128xf32>
    %103 = vector.broadcast %12 : vector<1x128xf32> to vector<16x128xf32>
    %104 = arith.addf %102, %103 : vector<16x128xf32>
    %c0_30 = arith.constant 0 : index
    %c0_31 = arith.constant 0 : index
    %105 = vector.load %arg7[%c0_30, %c0_31] : memref<16x128xf32, #tpu.memory_space<vmem>>, vector<16x128xf32>
    tpu.vector_store %arg7[%c0_30, %c0_31], %104 {strides = array<i32>} : memref<16x128xf32, #tpu.memory_space<vmem>>, vector<16x128xf32>,
    return
  }
  func.func @transform_0(%arg0: i32) -> (i32, i32) {
    %c0_i32 = arith.constant 0 : i32
    %c0_i32_0 = arith.constant 0 : i32
    return %arg0, %c0_i32 : i32, i32
  }
  func.func @transform_1(%arg0: i32) -> (i32, i32) {
    %c0_i32 = arith.constant 0 : i32
    %c0_i32_0 = arith.constant 0 : i32
    return %arg0, %c0_i32 : i32, i32
  }
  func.func @transform_2(%arg0: i32) -> (i32, i32) {
    %c0_i32 = arith.constant 0 : i32
    %c0_i32_0 = arith.constant 0 : i32
    %c0_i32_1 = arith.constant 0 : i32
    return %c0_i32, %c0_i32_0 : i32, i32
  }
  func.func @transform_3(%arg0: i32) -> (i32, i32) {
    %c0_i32 = arith.constant 0 : i32
    %c0_i32_0 = arith.constant 0 : i32
    %c0_i32_1 = arith.constant 0 : i32
    return %c0_i32, %c0_i32_0 : i32, i32
  }
  func.func @transform_4(%arg0: i32) -> (i32, i32) {
    %c0_i32 = arith.constant 0 : i32
    %c0_i32_0 = arith.constant 0 : i32
    %c0_i32_1 = arith.constant 0 : i32
    return %c0_i32, %c0_i32_0 : i32, i32
  }
  func.func @transform_5(%arg0: i32) -> (i32, i32) {
    %c0_i32 = arith.constant 0 : i32
    %c0_i32_0 = arith.constant 0 : i32
    %c0_i32_1 = arith.constant 0 : i32
    return %c0_i32, %c0_i32_0 : i32, i32
  }
  func.func @transform_6(%arg0: i32) -> (i32, i32) {
    %c0_i32 = arith.constant 0 : i32
    %c0_i32_0 = arith.constant 0 : i32
    return %arg0, %c0_i32 : i32, i32
  }
}

</mosaic_0001>

<bundles_post_ra>
// kernel: tpu_custom_call.1
= control target key start
LH: loop header
LB: loop body
LE: loop exit
PB: predicated region body
PF: predicated region fallthrough
CT: control target
= control target key end

     0   :  { %s1506_s0 = inlined_call_operand.hbm [shape: f32[64,256], index: 0, kind: input, shape index: {}]   ;;  %s1507_s1 = inlined_call_operand.vmem [shape: f32[64,1], index: 1, kind: input, shape index: {}]   ;;  %s1508_s2 = inlined_call_operand.hbm [shape: f32[128,256], index: 2, kind: input, shape index: {}]   ;;  %s1509_s3 = inlined_call_operand.hbm [shape: f32[128,256], index: 3, kind: input, shape index: {}]   ;;  %s1510_s4 = inlined_call_operand.vmem [shape: f32[8,128], index: 4, kind: input, shape index: {}]   ;;  %s1511_s5 = inlined_call_operand.<no memory space> [shape: f32[1,1], index: 5, kind: input, shape index: {}]   ;;  %s1512_s6 = inlined_call_operand.hbm [shape: f32[64,128], index: 6, kind: output, shape index: {}]  }
   0x1   :  { %11 = sst [smem:[#allocation2]] %s1511_s5 }
   0x2   :  { %12 = vsyncpa [#allocation4], 0 }
   0x3   :  { %14 = vsyncpa [#allocation4 + $0x1], 0 }
   0x4   :  { %15 = vsyncpa [#allocation7], 0 }
   0x5   :  { %16 = vsyncpa [#allocation5], 0 }
   0x6   :  { %18 = vsyncpa [#allocation5 + $0x1], 0  ;;  %s1209_s23 = smov 0   ;;  %s1211_s24 = smov 0  }
   0x7   :  { %s1213_s25 = smov 0   ;;  %s1215_s26 = smov 0  }
   0x8 LB: > { %s1230_s5 = sadd.s32 4294967295, %s1159_s26   ;;  %s819_s27 = sadd.s32 4294967294, %s1159_s26   ;;  %s1159_s26 = sphi %s1215_s26, %s1532_s26   ;;  %s1155_s25 = sphi %s1213_s25, %s1531_s25   ;;  %s1151_s24 = sphi %s1211_s24, %s1530_s24   ;;  %s1147_s23 = sphi %s1209_s23, %s1529_s23  }
   0x9   : > { %p44_p0 = scmp.ne.s32.totalorder %s1151_s24, %s1147_s23  ;;  %p1513_p1 = scmp.eq.s32.totalorder %s1230_s5, 0 }
   0xa   : > { %p184_p3 = scmp.eq.s32.totalorder %s819_s27, 3  ;;  %p820_p5 = scmp.ge.s32.totalorder %s1159_s26, 1 }
   0xb   : > { %p1239_p4 = por %p1513_p1, %p44_p0  ;;  %p191_p7 = scmp.lt.s32.totalorder %s1159_s26, 5 }
   0xc   : > { %p1244_p6 = por %p184_p3, %p44_p0  ;;  %s1161_s7 = smov [#allocation6]  }
   0xd   : > { %s1516_s28 = scalar_select %p1239_p4, 1, 0 }
   0xe   : > { %s1517_s29 = scalar_select %p1244_p6, 1, 0 }
   0xf   : > { %p1249_p8 = pnand %p820_p5, %p191_p7  ;;  %s203_s8 = sshll.u32 %s1161_s7, 4  ;;  %s204_s8 = int_to_ptr.vmem [resolvable:$true] %s203_s8 }
  0x10   : > { %s1162_s10 = smov [#allocation8]   ;;  %s1003_s14 = scalar_lea.hbm %s1508_s2, 4096 }
  0x11   : > { %s1518_s30 = scalar_select %p1249_p8, 1, 0 }
  0x12   : > { %p921_p9 = pneg %p1249_p8  ;;  %s216_s11 = sshll.u32 %s1162_s10, 4  ;;  %s1261_s11 = int_to_ptr.vmem [resolvable:$true] %s216_s11 }
  0x13   : > { %p1004_p11 = scmp.ne.s32.totalorder %s1508_s2, %s1003_s14  ;;  %p1010_p3 = scmp.lt.u32.totalorder %s1003_s14, %s1508_s2 }
  0x14   : > { %p1257_p10 = pnand %p921_p9, %p1513_p1 }
  0x16   : > { %p1005_p12 = pneg %p1257_p10 }
  0x18   : > { %p1006_p13 = pnand %p1005_p12, %p1004_p11 }
  0x1a   : > { %p1007_p0 = pneg %p1006_p13 }
  0x1c   : > { %p1012_p5 = pnand %p1010_p3, %p1007_p0 }
  0x1e   : > { %1015 = shalt.err (!%p1012_p5)
}
  0x1f   : > { %s1016_s19 = scalar_lea.vmem %s204_s8, 4096  ;;  %p1024_p2 = scmp.lt.s32.totalorder %s204_s8, %s204_s8 }
  0x20   : > { %p1017_p7 = scmp.ne.s32.totalorder %s204_s8, %s1016_s19  ;;  %p1025_p6 = scmp.lt.s32.totalorder %s1016_s19, %s1016_s19 }
  0x22   : > { %p1019_p9 = pnand %p1017_p7, %p1005_p12  ;;  %p1026_p4 = por %p1025_p6, %p1024_p2 }
  0x24   : > { %p1020_p1 = pneg %p1019_p9 }
  0x26   : > { %p1027_p8 = pnand %p1026_p4, %p1020_p1 }
  0x28   : > { %1030 = shalt.err (!%p1027_p8)
}
  0x29   : > { %s1163_s20 = smov 256   ;;  %s1164_s21 = smov 16  }
  0x2a   : > { %924 = dma.hbm_to_vmem [thread:$0]  (!%p1257_p10), %s1508_s2, 4096, %s204_s8, [#allocation7], %s1163_s20, %s1163_s20, %s1164_s21  }
  0x2b   : > { %s1031_s12 = scalar_lea.hbm %s1509_s3, 4096 }
  0x2c   : > { %p1032_p1 = scmp.ne.s32.totalorder %s1509_s3, %s1031_s12  ;;  %p1038_p6 = scmp.lt.u32.totalorder %s1031_s12, %s1509_s3 }
  0x2e   : > { %p1034_p2 = pnand %p1032_p1, %p1005_p12 }
  0x30   : > { %p1035_p4 = pneg %p1034_p2 }
  0x32   : > { %p1040_p8 = pnand %p1038_p6, %p1035_p4 }
  0x34   : > { %1043 = shalt.err (!%p1040_p8)
}
  0x35   : > { %s1044_s8 = scalar_lea.vmem %s1261_s11, 4096  ;;  %p1052_p3 = scmp.lt.s32.totalorder %s1261_s11, %s1261_s11 }
  0x36   : > { %p1045_p11 = scmp.ne.s32.totalorder %s1261_s11, %s1044_s8  ;;  %p1053_p5 = scmp.lt.s32.totalorder %s1044_s8, %s1044_s8 }
  0x38   : > { %p1047_p13 = pnand %p1045_p11, %p1005_p12  ;;  %p1054_p7 = por %p1053_p5, %p1052_p3 }
  0x3a   : > { %p1048_p0 = pneg %p1047_p13 }
  0x3c   : > { %p1055_p9 = pnand %p1054_p7, %p1048_p0 }
  0x3e   : > { %1058 = shalt.err (!%p1055_p9)
}
  0x3f   : > { %927 = dma.hbm_to_vmem [thread:$0]  (!%p1257_p10), %s1509_s3, 4096, %s1261_s11, [#allocation7], %s1163_s20, %s1163_s20, %s1164_s21  }
  0x40   : > { %s1317_s9 = sadd.s32 1, %s1159_s26   ;;  %s31_s19 = sadd.s32 1, %s1155_s25 }
  0x41   : > { %s28_s22 = ssub.s32 %s1159_s26, %s1317_s9  ;;  %p38_p12 = scmp.ne.s32.totalorder %s1155_s25, %s1151_s24 }
  0x42   : > { %p29_p1 = scmp.eq.s32.totalorder %s28_s22, 0  ;;  %p39_p2 = scmp.eq.s32.totalorder %s1159_s26, 0 }
  0x43   : > { %p1520_p4 = scmp.eq.s32.totalorder %s1230_s5, 3  ;;  %p938_p8 = scmp.lt.s32.totalorder %s1159_s26, 4 }
  0x44   : > { %s1333_s7 = scalar_select %p29_p1, %s1155_s25, %s31_s19  }
  0x45   : > { %p1327_p6 = por %p1520_p4, %p38_p12  ;;  %p40_p11 = por %p39_p2, %p38_p12 }
  0x46   : > { %s236_s10 = sand.u32 1, %s1155_s25   ;;  %s843_s11 = sshll.u32 %s1159_s26, 9 }
  0x47   : > { %s824_s12 = sshll.u32 %s236_s10, 5  ;;  %s1340_s15 = scalar_lea.hbm %s1506_s0, %s843_s11 }
  0x48   : > { %s240_s16 = scalar_lea.vmem [#allocation3], %s824_s12  ;;  %p1344_p10 = pnand %p938_p8, %p40_p11 }
  0x49   : > { %s248_s8 = sshll.u32 %s240_s16, 4  ;;  %s1348_s18 = scalar_lea.sflag [#allocation4], %s236_s10  ;;  %s1342_s8 = int_to_ptr.vmem [resolvable:$true] %s248_s8 }
  0x4a   : > { %s1059_s19 = scalar_lea.hbm %s1340_s15, 512  ;;  %p1061_p0 = pneg %p1344_p10 }
  0x4b   : > { %p1060_p13 = scmp.ne.s32.totalorder %s1340_s15, %s1059_s19  ;;  %s1064_s11 = scalar_lea.hbm %s1506_s0, 2048 }
  0x4c   : > { %p1065_p7 = scmp.lt.u32.totalorder %s1340_s15, %s1506_s0  ;;  %p1066_p9 = scmp.lt.u32.totalorder %s1064_s11, %s1059_s19 }
  0x4d   : > { %p1062_p3 = pnand %p1061_p0, %p1060_p13  ;;  %p1068_p1 = scmp.lt.u32.totalorder %s1059_s19, %s1340_s15 }
  0x4e   : > { %p1067_p12 = por %p1066_p9, %p1065_p7 }
  0x4f   : > { %p1063_p5 = pneg %p1062_p3 }
  0x50   : > { %p1069_p2 = por %p1068_p1, %p1067_p12 }
  0x52   : > { %p1070_p4 = pnand %p1069_p2, %p1063_p5 }
  0x54   : > { %1073 = shalt.err (!%p1070_p4)
}
  0x55   : > { %s1074_s10 = scalar_lea.vmem %s1342_s8, 512  ;;  %s1165_s16 = smov [#allocation3]  }
  0x56   : > { %p1075_p8 = scmp.ne.s32.totalorder %s1342_s8, %s1074_s10  ;;  %s1079_s22 = sshll.u32 %s1165_s16, 4  ;;  %s1080_s22 = int_to_ptr.vmem [resolvable:$false] %s1079_s22 }
  0x57   : > { %s1081_s12 = scalar_lea.vmem %s1080_s22, 1024  ;;  %p1082_p3 = scmp.lt.s32.totalorder %s1342_s8, %s1080_s22 }
  0x58   : > { %p1077_p11 = pnand %p1075_p8, %p1061_p0  ;;  %p1083_p7 = scmp.lt.s32.totalorder %s1081_s12, %s1074_s10 }
  0x5a   : > { %p1078_p13 = pneg %p1077_p11  ;;  %p1084_p9 = por %p1083_p7, %p1082_p3 }
  0x5c   : > { %p1085_p12 = pnand %p1084_p9, %p1078_p13 }
  0x5e   : > { %1088 = shalt.err (!%p1085_p12)
}
  0x5f   : > { %931 = dma.hbm_to_vmem [thread:$0]  (!%p1344_p10), %s1340_s15, 512, %s1342_s8, %s1348_s18, %s1163_s20, %s1163_s20, %s1164_s21  }
  0x60   : > { %p1523_p0 = scmp.ne.s32.totalorder %s1518_s30, 0 }
  0x61   : > { %s1382_s19 = sand.u32 (!%p1523_p0), 1, %s1151_s24   ;;  %p1524_p5 = scmp.ne.s32.totalorder (!%p1523_p0), %s1516_s28, 0 }
  0x62   : > { %269 = sbr.rel (%p1523_p0) target bundleno = 1206 (0x4b6), region = 44  ;;  %s829_s11 = sshll.u32 (!%p1523_p0), %s1382_s19, 5 }
  0x63   : > { %s272_s13 = scalar_lea.sflag (!%p1523_p0), [#allocation4], %s1382_s19  ;;  %s1386_s14 = scalar_lea.vmem (!%p1523_p0), [#allocation3], %s829_s11 }
  0x69   : > { %1134 = dma.done.wait (%p1524_p5), %s272_s13, 512  }
  0x6a   : > { %1136 = vsyncadd (%p1524_p5), %s272_s13, 4294966784  ;;  %p1525_p10 = scmp.eq.s32.totalorder %s1230_s5, 0 }
  0x6c   : > { %1138 = dma.done.wait (%p1525_p10), [#allocation7], 8192   ;;  %p1526_p1 = pmov %p1525_p10 }
  0x6d   : > { %v1166_v0 = vmov 0.0   ;;  %v1167_v1 = vmov 0   ;;  %v333_v2 = vld [vmem:[#allocation6 + $0x8] sm:$0xff]  ;;  %v335_v3 = vld [vmem:[#allocation6 + $0x18] sm:$0xff]  ;;  %v332_v7 = vld [vmem:[#allocation6] sm:$0xff]  ;;  %s833_s28 = sshll.u32 %s1230_s5, 1 }
  0x6e   : > { %1140 = vsyncadd (%p1526_p1), [#allocation7], 4294959104  ;;  %428 = vmatprep.mubr.f32.mxu0 %v1166_v0  ;;  %537 = vmatprep.mubr.f32.mxu1 %v1166_v0  ;;  %v442_v4 = vld [vmem:[#allocation8 + $0x8] sm:$0xff]  ;;  %v845_v5 = vpack.c.bf16 %v335_v3, %v333_v2  ;;  %v444_v6 = vld [vmem:[#allocation8 + $0x18] sm:$0xff]  ;;  %p1401_p2 = scmp.lt.s32.totalorder %s833_s28, 7  ;;  %s631_s10 = sld [smem:[#allocation2]] }
  0x6f   : > { %982 = vset.pattern.permute.xlu0 %v1167_v1  ;;  %v334_v8 = vld [vmem:[#allocation6 + $0x10] sm:$0xff]  ;;  %v877_v9 = vpack.c.bf16 %v444_v6, %v442_v4  ;;  %v441_v11 = vld [vmem:[#allocation8] sm:$0xff]  ;;  %v337_v13 = vld [vmem:[#allocation6 + $0x28] sm:$0xff]  ;;  %s832_s16 = sshll.u32 %s1382_s19, 4  ;;  %s844_s22 = sshll.u32 %s1230_s5, 8 }
  0x70   : > { %v847_v10 = vpack.c.bf16 %v334_v8, %v332_v7  ;;  %v443_v12 = vld [vmem:[#allocation8 + $0x10] sm:$0xff]  ;;  %846 = vmatprep.subr.bf16.mxu0 %v845_v5  ;;  %v339_v15 = vld [vmem:[#allocation6 + $0x38] sm:$0xff]  ;;  %v446_v16 = vld [vmem:[#allocation8 + $0x28] sm:$0xff]  ;;  %s1534_s28 = smov (!%p1401_p2, %s833_s28), 7  ;;  %s316_s12 = scalar_lea.vmem [#allocation9], %s832_s16 }
  0x71   : > { %v879_v14 = vpack.c.bf16 %v443_v12, %v441_v11  ;;  %v448_v17 = vld [vmem:[#allocation8 + $0x38] sm:$0xff]  ;;  %878 = vmatprep.subr.bf16.mxu1 %v877_v9  ;;  %v849_v18 = vpack.c.bf16 %v339_v15, %v337_v13  ;;  %v336_v20 = vld [vmem:[#allocation6 + $0x20] sm:$0xff]  ;;  %v338_v21 = vld [vmem:[#allocation6 + $0x30] sm:$0xff]  ;;  %s834_s20 = sshll.u32 %s1534_s28, 3  ;;  %s715_s11 = sshll.u32 %s316_s12, 4  ;;  %s1463_s11 = int_to_ptr.vmem [resolvable:$true] %s715_s11 }
  0x72   : > { %848 = vmatpush1.bf16.msra.mxu0 %v847_v10  ;;  %v881_v19 = vpack.c.bf16 %v448_v17, %v446_v16  ;;  %v445_v22 = vld [vmem:[#allocation8 + $0x20] sm:$0xff]  ;;  %v851_v23 = vpack.c.bf16 %v338_v21, %v336_v20  ;;  %v447_v24 = vld [vmem:[#allocation8 + $0x30] sm:$0xff]  ;;  %v341_v25 = vld [vmem:[#allocation6 + $0x48] sm:$0xff]  ;;  %s322_s8 = scalar_lea.vmem %s1507_s1, %s834_s20  ;;  %s1461_s28 = scalar_lea.hbm %s1512_s6, %s844_s22 }
  0x73   : > { %880 = vmatpush1.bf16.msra.mxu1 %v879_v14  ;;  %v343_v26 = vld [vmem:[#allocation6 + $0x58] sm:$0xff]  ;;  %850 = vmatprep.subr.bf16.mxu0 %v849_v18  ;;  %v883_v27 = vpack.c.bf16 %v447_v24, %v445_v22  ;;  %v450_v29 = vld [vmem:[#allocation8 + $0x48] sm:$0xff]  ;;  %v340_v31 = vld [vmem:[#allocation6 + $0x40] sm:$0xff]  ;;  %s702_s30 = scalar_lea.sflag [#allocation5], %s1382_s19  ;;  %s1089_s20 = scalar_lea.vmem %s1463_s11, 256 }
  0x74   : > { %882 = vmatprep.subr.bf16.mxu1 %v881_v19  ;;  %v853_v28 = vpack.c.bf16 %v343_v26, %v341_v25  ;;  %v452_v30 = vld [vmem:[#allocation8 + $0x58] sm:$0xff]  ;;  %v342_v33 = vld [vmem:[#allocation6 + $0x50] sm:$0xff]  ;;  %v449_v34 = vld [vmem:[#allocation8 + $0x40] sm:$0xff]  ;;  %p1090_p4 = scmp.ne.s32.totalorder %s1463_s11, %s1089_s20  ;;  %s1168_s5 = smov [#allocation9]  }
  0x75   : > { %v885_v32 = vpack.c.bf16 %v452_v30, %v450_v29  ;;  %v451_v35 = vld [vmem:[#allocation8 + $0x50] sm:$0xff]  ;;  %v855_v36 = vpack.c.bf16 %v342_v33, %v340_v31  ;;  %v345_v37 = vld [vmem:[#allocation6 + $0x68] sm:$0xff]  ;;  %v347_v38 = vld [vmem:[#allocation6 + $0x78] sm:$0xff]  ;;  %s1093_s21 = sshll.u32 %s1168_s5, 4  ;;  %s1094_s21 = int_to_ptr.vmem [resolvable:$false] %s1093_s21 }
  0x76   : > { %852 = vmatpush1.bf16.msra.mxu0 %v851_v23  ;;  %v454_v39 = vld [vmem:[#allocation8 + $0x68] sm:$0xff]  ;;  %v887_v40 = vpack.c.bf16 %v451_v35, %v449_v34  ;;  %v857_v41 = vpack.c.bf16 %v347_v38, %v345_v37  ;;  %v456_v42 = vld [vmem:[#allocation8 + $0x78] sm:$0xff]  ;;  %v344_v43 = vld [vmem:[#allocation6 + $0x60] sm:$0xff]  ;;  %p1091_p8 = pnand %p1090_p4, %p1327_p6  ;;  %s1095_s15 = scalar_lea.vmem %s1094_s21, 512 }
  0x77   : > { %884 = vmatpush1.bf16.msra.mxu1 %v883_v27  ;;  %854 = vmatprep.subr.bf16.mxu0 %v853_v28  ;;  %v346_v44 = vld [vmem:[#allocation6 + $0x70] sm:$0xff]  ;;  %v889_v45 = vpack.c.bf16 %v456_v42, %v454_v39  ;;  %v453_v46 = vld [vmem:[#allocation8 + $0x60] sm:$0xff]  ;;  %v349_v48 = vld [vmem:[#allocation6 + $0x88] sm:$0xff]  ;;  %p1096_p13 = scmp.lt.s32.totalorder %s1463_s11, %s1094_s21  ;;  %p1097_p3 = scmp.lt.s32.totalorder %s1095_s15, %s1089_s20 }
  0x78   : > { %886 = vmatprep.subr.bf16.mxu1 %v885_v32  ;;  %v455_v47 = vld [vmem:[#allocation8 + $0x70] sm:$0xff]  ;;  %v351_v49 = vld [vmem:[#allocation6 + $0x98] sm:$0xff]  ;;  %v458_v50 = vld [vmem:[#allocation8 + $0x88] sm:$0xff]  ;;  %v859_v52 = vpack.c.bf16 %v346_v44, %v344_v43  ;;  %p1092_p11 = pneg %p1091_p8 }
  0x79   : > { %v460_v51 = vld [vmem:[#allocation8 + $0x98] sm:$0xff]  ;;  %v891_v53 = vpack.c.bf16 %v455_v47, %v453_v46  ;;  %v861_v54 = vpack.c.bf16 %v351_v49, %v349_v48  ;;  %v348_v55 = vld [vmem:[#allocation6 + $0x80] sm:$0xff]  ;;  %v350_v56 = vld [vmem:[#allocation6 + $0x90] sm:$0xff]  ;;  %p1098_p7 = por %p1097_p3, %p1096_p13 }
  0x7a   : > { %856 = vmatpush1.bf16.msra.mxu0 %v855_v36  ;;  %v457_v57 = vld [vmem:[#allocation8 + $0x80] sm:$0xff]  ;;  %v893_v58 = vpack.c.bf16 %v460_v51, %v458_v50  ;;  %v459_v59 = vld [vmem:[#allocation8 + $0x90] sm:$0xff]  ;;  %v353_v60 = vld [vmem:[#allocation6 + $0xa8] sm:$0xff]  ;;  %v863_v1 = vpack.c.bf16 %v350_v56, %v348_v55 }
  0x7b   : > { %888 = vmatpush1.bf16.msra.mxu1 %v887_v40  ;;  %858 = vmatprep.subr.bf16.mxu0 %v857_v41  ;;  %v355_v61 = vld [vmem:[#allocation6 + $0xb8] sm:$0xff]  ;;  %v462_v62 = vld [vmem:[#allocation8 + $0xa8] sm:$0xff]  ;;  %v895_v2 = vpack.c.bf16 %v459_v59, %v457_v57  ;;  %v352_v4 = vld [vmem:[#allocation6 + $0xa0] sm:$0xff]  ;;  %v562_v41 = vlaneseq  ;;  %p1099_p9 = pnand %p1098_p7, %p1092_p11 }
  0x7c   : > { %890 = vmatprep.subr.bf16.mxu1 %v889_v45  ;;  %v464_v63 = vld [vmem:[#allocation8 + $0xb8] sm:$0xff]  ;;  %v865_v3 = vpack.c.bf16 %v355_v61, %v353_v60  ;;  %v354_v5 = vld [vmem:[#allocation6 + $0xb0] sm:$0xff]  ;;  %v461_v6 = vld [vmem:[#allocation8 + $0xa0] sm:$0xff] }
  0x7d   : > { %v897_v7 = vpack.c.bf16 %v464_v63, %v462_v62  ;;  %v463_v8 = vld [vmem:[#allocation8 + $0xb0] sm:$0xff]  ;;  %v357_v9 = vld [vmem:[#allocation6 + $0xc8] sm:$0xff]  ;;  %v359_v10 = vld [vmem:[#allocation6 + $0xd8] sm:$0xff]  ;;  %v867_v13 = vpack.c.bf16 %v354_v5, %v352_v4  ;;  %v1421_v42 = vshrl.u32 %v562_v41, 7 }
  0x7e   : > { %860 = vmatpush1.bf16.msra.mxu0 %v859_v52  ;;  %v466_v11 = vld [vmem:[#allocation8 + $0xc8] sm:$0xff]  ;;  %v468_v12 = vld [vmem:[#allocation8 + $0xd8] sm:$0xff]  ;;  %v356_v14 = vld [vmem:[#allocation6 + $0xc0] sm:$0xff]  ;;  %v899_v15 = vpack.c.bf16 %v463_v8, %v461_v6  ;;  %v869_v16 = vpack.c.bf16 %v359_v10, %v357_v9 }
  0x7f   : > { %892 = vmatpush1.bf16.msra.mxu1 %v891_v53  ;;  %862 = vmatprep.subr.bf16.mxu0 %v861_v54  ;;  %v358_v17 = vld [vmem:[#allocation6 + $0xd0] sm:$0xff]  ;;  %v465_v18 = vld [vmem:[#allocation8 + $0xc0] sm:$0xff]  ;;  %v901_v20 = vpack.c.bf16 %v468_v12, %v466_v11  ;;  %v361_v21 = vld [vmem:[#allocation6 + $0xe8] sm:$0xff]  ;;  %v564_v43 = vsub.s32 0, %v1421_v42  ;;  %v572_v47 = vsub.s32 1, %v1421_v42 }
  0x80   : > { %894 = vmatprep.subr.bf16.mxu1 %v893_v58  ;;  %v467_v19 = vld [vmem:[#allocation8 + $0xd0] sm:$0xff]  ;;  %v363_v22 = vld [vmem:[#allocation6 + $0xf8] sm:$0xff]  ;;  %v329_v23 = vld [vmem:[%s322_s8] sm:$0xff]  ;;  %v871_v26 = vpack.c.bf16 %v358_v17, %v356_v14  ;;  %v607_v17 = vsub.s32 3, %v1421_v42 }
  0x81   : > { %v470_v24 = vld [vmem:[#allocation8 + $0xe8] sm:$0xff]  ;;  %v472_v25 = vld [vmem:[#allocation8 + $0xf8] sm:$0xff]  ;;  %554 = vperm.xlu0 %982, %v329_v23   ;;  %v903_v28 = vpack.c.bf16 %v467_v19, %v465_v18  ;;  %v873_v29 = vpack.c.bf16 %v363_v22, %v361_v21  ;;  %v360_v30 = vld [vmem:[#allocation6 + $0xe0] sm:$0xff] }
  0x82   : > { %864 = vmatpush1.bf16.msra.mxu0 %v863_v1  ;;  %v330_v27 = vld [vmem:[%s322_s8 + $0x8] sm:$0xff]  ;;  %v362_v31 = vld [vmem:[#allocation6 + $0xf0] sm:$0xff]  ;;  %v905_v32 = vpack.c.bf16 %v472_v25, %v470_v24  ;;  %v469_v33 = vld [vmem:[#allocation8 + $0xe0] sm:$0xff] }
  0x83   : > { %896 = vmatpush1.bf16.msra.mxu1 %v895_v2  ;;  %866 = vmatprep.subr.bf16.mxu0 %v865_v3  ;;  %v471_v34 = vld [vmem:[#allocation8 + $0xf0] sm:$0xff]  ;;  %v875_v35 = vpack.c.bf16 %v362_v31, %v360_v30  ;;  %v325_v37 = vld [vmem:[%s1386_s14] sm:$0xff]  ;;  %v326_v38 = vld [vmem:[%s1386_s14 + $0x8] sm:$0xff]  ;;  %v623_v30 = vsub.s32 4, %v1421_v42 }
  0x84   : > { %898 = vmatprep.subr.bf16.mxu1 %v897_v7  ;;  %v907_v36 = vpack.c.bf16 %v471_v34, %v469_v33  ;;  %v327_v39 = vld [vmem:[%s1386_s14 + $0x10] sm:$0xff]  ;;  %v328_v40 = vld [vmem:[%s1386_s14 + $0x18] sm:$0xff]  ;;  %v1427_v44 = vld [vmem:[%s1510_s4] sm:$0xff] }
  0x85   : > { %559 = vperm.xlu0 %982, %v330_v27   ;;  %v565_v45 = vrot.slane %v1427_v44, %v564_v43  ;;  %v573_v53 = vrot.slane %v1427_v44, %v572_v47  ;;  %v608_v21 = vrot.slane %v1427_v44, %v607_v17  ;;  %v624_v34 = vrot.slane %v1427_v44, %v623_v30 }
  0x86   : > { %868 = vmatpush1.bf16.msra.mxu0 %v867_v13  ;;  %v632_v43 = vstv %s631_s10 }
  0x87   : > { %900 = vmatpush1.bf16.msra.mxu1 %v899_v15  ;;  %870 = vmatprep.subr.bf16.mxu0 %v869_v16  ;;  %v601_v16 = vsub.s32 2, %v1421_v42 }
  0x88   : > { %902 = vmatprep.subr.bf16.mxu1 %v901_v20 }
  0x89   : > { %v602_v18 = vrot.slane %v1427_v44, %v601_v16 }
  0x8a   : > { %872 = vmatpush1.bf16.msra.mxu0 %v871_v26 }
  0x8b   : > { %904 = vmatpush1.bf16.msra.mxu1 %v903_v28  ;;  %874 = vmatprep.subr.bf16.mxu0 %v873_v29 }
  0x8c   : > { %906 = vmatprep.subr.bf16.mxu1 %v905_v32 }
  0x8e   : > { %876 = vmatpush1.bf16.msra.mxu0 %v875_v35 }
  0x8f   : > { %908 = vmatpush1.bf16.msra.mxu1 %v907_v36 }
  0x91   : > { %429 = vmatmul.mubr.f32.vlgmr.msra.gmra.mrb[0].mxu0 %v325_v37 }
  0x92   : > { %538 = vmatmul.mubr.f32.vlgmr.msra.gmra.mrb[0].mxu1 %v326_v38  ;;  %434 = vmatprep.mubr.f32.mxu0 %v1166_v0 }
  0x93   : > { %543 = vmatprep.mubr.f32.mxu1 %v1166_v0 }
  0x95   : > { %435 = vmatmul.mubr.f32.gmra.mrb[2].mxu0 %v327_v39 }
  0x96   : > { %544 = vmatmul.mubr.f32.gmra.mrb[2].mxu1 %v328_v40 }
 0x100   : > { %v555_v46 = vpop.permute.xlu0 %554 }
 0x101   : > { %v566_v48 = vmul.f32 %v565_v45, %v555_v46 }
 0x104   : > { %v560_v54 = vpop.permute.xlu0 %559 }
 0x105   : > { %v567_v59 = vmul.f32 %v565_v45, %v560_v54 }
 0x164   : > { %v430_v0 = vpop.f32.mrb[0].mxu0 }
 0x165   : > { %v539_v49 = vpop.f32.mrb[0].mxu1  ;;  %v1431_v50 = vpop.f32.mrb[1].mxu0 }
 0x166   : > { %v550_v51 = vadd.f32 %v539_v49, %v430_v0  ;;  %v1433_v52 = vpop.f32.mrb[1].mxu1 }
 0x168   : > { %v568_v55 = vadd.f32 %v566_v48, %v550_v51  ;;  %v436_v56 = vpop.f32.mrb[2].mxu0 }
 0x169   : > { %v545_v57 = vpop.f32.mrb[2].mxu1  ;;  %v1436_v58 = vpop.f32.mrb[3].mxu0 }
 0x16a   : > { %v551_v60 = vadd.f32 %v545_v57, %v436_v56  ;;  %v1438_v61 = vpop.f32.mrb[3].mxu1  ;;  %v574_v62 = vadd.f32 %v573_v53, %v568_v55 }
 0x16c   : > { %v569_v63 = vadd.f32 %v567_v59, %v551_v60  ;;  %576 = vadd.xlane.f32.xlu1 %v574_v62  ;;  %v661_v60 = vsub.s32 5, %v1421_v42 }
 0x16e   : > { %v575_v1 = vadd.f32 %v573_v53, %v569_v63 }
 0x170   : > { %578 = vadd.xlane.f32.xlu1 %v575_v1 }
 0x1f9   : > { %v577_v2 = vpop.xlane.xlu1 %576 }
 0x1fa   : > { %v581_v3 = vmul.f32 0.0078125, %v577_v2 }
 0x1fc   : > { %v583_v4 = vsub.f32 %v574_v62, %v581_v3 }
 0x1fd   : > { %v579_v5 = vpop.xlane.xlu1 %578 }
 0x1fe   : > { %v582_v6 = vmul.f32 0.0078125, %v579_v5  ;;  %v585_v7 = vmul.f32 %v583_v4, %v583_v4 }
 0x200   : > { %v584_v8 = vsub.f32 %v575_v1, %v582_v6  ;;  %587 = vadd.xlane.f32.xlu0 %v585_v7 }
 0x202   : > { %v586_v9 = vmul.f32 %v584_v8, %v584_v8 }
 0x204   : > { %589 = vadd.xlane.f32.xlu1 %v586_v9 }
 0x28d   : > { %v588_v10 = vpop.xlane.xlu0 %587 }
 0x28e   : > { %v591_v11 = vmul.f32 0.0078125, %v588_v10 }
 0x290   : > { %v593_v12 = vadd.f32 1e-05, %v591_v11 }
 0x291   : > { %v590_v13 = vpop.xlane.xlu1 %589 }
 0x292   : > { %983 = vrsqrt.f32 %v593_v12  ;;  %v592_v14 = vmul.f32 0.0078125, %v590_v13 }
 0x294   : > { %v594_v15 = vadd.f32 1e-05, %v592_v14 }
 0x296   : > { %985 = vrsqrt.f32 %v594_v15 }
 0x29c   : > { %v984_v19 = vpop.eup %983 }
 0x29d   : > { %v597_v20 = vmul.f32 %v984_v19, %v583_v4  ;;  %v662_v4 = vrot.slane %v1427_v44, %v661_v60 }
 0x29f   : > { %v603_v22 = vmul.f32 %v602_v18, %v597_v20 }
 0x2a0   : > { %v986_v23 = vpop.eup %985 }
 0x2a1   : > { %v609_v24 = vadd.f32 %v608_v21, %v603_v22  ;;  %v598_v25 = vmul.f32 %v986_v23, %v584_v8  ;;  %v689_v23 = vsub.s32 6, %v1421_v42 }
 0x2a3   : > { %v613_v26 = vmul.f32 0.70710677, %v609_v24  ;;  %v604_v27 = vmul.f32 %v602_v18, %v598_v25  ;;  %v611_v32 = vmul.f32 0.5, %v609_v24  ;;  %v695_v24 = vsub.s32 7, %v1421_v42 }
 0x2a4   : > { %v690_v25 = vrot.slane %v1427_v44, %v689_v23 }
 0x2a5   : > { %987 = verf.f32 %v613_v26  ;;  %v610_v28 = vadd.f32 %v608_v21, %v604_v27  ;;  %v696_v27 = vrot.slane %v1427_v44, %v695_v24 }
 0x2a7   : > { %v614_v29 = vmul.f32 0.70710677, %v610_v28  ;;  %v612_v38 = vmul.f32 0.5, %v610_v28 }
 0x2a9   : > { %989 = verf.f32 %v614_v29 }
 0x2af   : > { %v988_v31 = vpop.eup %987 }
 0x2b0   : > { %v617_v33 = vadd.f32 1.0, %v988_v31 }
 0x2b2   : > { %v619_v35 = vmul.f32 %v617_v33, %v611_v32 }
 0x2b3   : > { %v990_v36 = vpop.eup %989 }
 0x2b4   : > { %v625_v37 = vmul.f32 %v624_v34, %v619_v35  ;;  %v618_v39 = vadd.f32 1.0, %v990_v36 }
 0x2b6   : > { %627 = vadd.xlane.f32.xlu1 %v625_v37  ;;  %v620_v40 = vmul.f32 %v618_v39, %v612_v38 }
 0x2b8   : > { %v626_v41 = vmul.f32 %v624_v34, %v620_v40 }
 0x2ba   : > { %629 = vadd.xlane.f32.xlu1 %v626_v41 }
 0x343   : > { %v628_v45 = vpop.xlane.xlu1 %627 }
 0x344   : > { %v633_v46 = vadd.f32 %v632_v43, %v628_v45 }
 0x346   : > { %v835_v47 = vmul.f32 -1.442695, %v633_v46 }
 0x347   : > { %v630_v48 = vpop.xlane.xlu1 %629 }
 0x348   : > { %991 = vpow2.f32 %v835_v47  ;;  %v634_v0 = vadd.f32 %v632_v43, %v630_v48 }
 0x34a   : > { %v836_v49 = vmul.f32 -1.442695, %v634_v0 }
 0x34c   : > { %993 = vpow2.f32 %v836_v49 }
 0x352   : > { %v992_v51 = vpop.eup %991 }
 0x353   : > { %v641_v53 = vadd.f32 1.0, %v992_v51 }
 0x355   : > { %995 = vrcp.f32 %v641_v53 }
 0x356   : > { %v994_v54 = vpop.eup %993 }
 0x357   : > { %v642_v55 = vadd.f32 1.0, %v994_v54 }
 0x359   : > { %997 = vrcp.f32 %v642_v55 }
 0x35f   : > { %v996_v56 = vpop.eup %995 }
 0x360   : > { %v647_v57 = vmul.f32 0.3, %v996_v56 }
 0x362   : > { %v649_v59 = vadd.f32 0.7, %v647_v57 }
 0x363   : > { %v998_v62 = vpop.eup %997 }
 0x364   : > { %v648_v63 = vmul.f32 0.3, %v998_v62  ;;  %v651_v1 = vsub.f32 1.0, %v649_v59  ;;  %v653_v2 = vmul.f32 %v649_v59, %v1431_v50 }
 0x366   : > { %v655_v3 = vmul.f32 %v651_v1, %v1433_v52  ;;  %v650_v5 = vadd.f32 0.7, %v648_v63 }
 0x368   : > { %v657_v6 = vadd.f32 %v655_v3, %v653_v2  ;;  %v652_v7 = vsub.f32 1.0, %v650_v5  ;;  %v654_v9 = vmul.f32 %v650_v5, %v1436_v58 }
 0x36a   : > { %v663_v8 = vadd.f32 %v662_v4, %v657_v6  ;;  %v656_v10 = vmul.f32 %v652_v7, %v1438_v61 }
 0x36c   : > { %665 = vadd.xlane.f32.xlu1 %v663_v8  ;;  %v658_v11 = vadd.f32 %v656_v10, %v654_v9 }
 0x36e   : > { %v664_v12 = vadd.f32 %v662_v4, %v658_v11 }
 0x370   : > { %667 = vadd.xlane.f32.xlu1 %v664_v12 }
 0x3f9   : > { %v666_v13 = vpop.xlane.xlu1 %665 }
 0x3fa   : > { %v669_v14 = vmul.f32 0.0078125, %v666_v13 }
 0x3fc   : > { %v671_v15 = vsub.f32 %v663_v8, %v669_v14 }
 0x3fd   : > { %v668_v50 = vpop.xlane.xlu1 %667 }
 0x3fe   : > { %v670_v16 = vmul.f32 0.0078125, %v668_v50  ;;  %v673_v52 = vmul.f32 %v671_v15, %v671_v15 }
 0x400   : > { %v672_v17 = vsub.f32 %v664_v12, %v670_v16  ;;  %675 = vadd.xlane.f32.xlu1 %v673_v52 }
 0x402   : > { %v674_v18 = vmul.f32 %v672_v17, %v672_v17 }
 0x404   : > { %677 = vadd.xlane.f32.xlu1 %v674_v18 }
 0x48d   : > { %v676_v19 = vpop.xlane.xlu1 %675 }
 0x48e   : > { %v679_v20 = vmul.f32 0.0078125, %v676_v19 }
 0x490   : > { %v681_v58 = vadd.f32 1e-05, %v679_v20 }
 0x491   : > { %v678_v21 = vpop.xlane.xlu1 %677 }
 0x492   : > { %999 = vrsqrt.f32 %v681_v58  ;;  %v680_v61 = vmul.f32 0.0078125, %v678_v21 }
 0x494   : > { %v682_v22 = vadd.f32 1e-05, %v680_v61 }
 0x496   : > { %1001 = vrsqrt.f32 %v682_v22 }
 0x49c   : > { %v1000_v26 = vpop.eup %999 }
 0x49d   : > { %v685_v28 = vmul.f32 %v1000_v26, %v671_v15 }
 0x49f   : > { %v691_v29 = vmul.f32 %v690_v25, %v685_v28 }
 0x4a0   : > { %v1002_v30 = vpop.eup %1001 }
 0x4a1   : > { %v697_v31 = vadd.f32 %v696_v27, %v691_v29  ;;  %v686_v32 = vmul.f32 %v1002_v30, %v672_v17 }
 0x4a3   : > { %v692_v33 = vmul.f32 %v690_v25, %v686_v32  ;;  %699 = vst [vmem:[%s316_s12] sm:$0xff] %v697_v31 }
 0x4a5   : > { %v698_v42 = vadd.f32 %v696_v27, %v692_v33 }
 0x4a7   : > { %700 = vst [vmem:[%s316_s12 + $0x8] sm:$0xff] %v698_v42 }
 0x4a8   : > { %1102 = shalt.err (!%p1099_p9)
}
 0x4a9   : > { %s1103_s8 = scalar_lea.hbm %s1461_s28, 256  ;;  %s1107_s10 = scalar_lea.hbm %s1512_s6, 1024 }
 0x4aa   : > { %p1104_p12 = scmp.ne.s32.totalorder %s1461_s28, %s1103_s8  ;;  %p1108_p10 = scmp.lt.u32.totalorder %s1461_s28, %s1512_s6 }
 0x4ab   : > { %p1109_p1 = scmp.lt.u32.totalorder %s1107_s10, %s1103_s8  ;;  %p1111_p4 = scmp.lt.u32.totalorder %s1103_s8, %s1461_s28 }
 0x4ac   : > { %p1105_p0 = pnand %p1104_p12, %p1327_p6 }
 0x4ad   : > { %p1110_p2 = por %p1109_p1, %p1108_p10 }
 0x4ae   : > { %p1106_p5 = pneg %p1105_p0 }
 0x4af   : > { %p1112_p8 = por %p1111_p4, %p1110_p2 }
 0x4b1   : > { %p1113_p11 = pnand %p1112_p8, %p1106_p5 }
 0x4b3   : > { %1116 = shalt.err (!%p1113_p11)
}
 0x4b4   : > { %s1169_s12 = smov 128   ;;  %s1170_s13 = smov 8  }
 0x4b5   : > { %919 = dma.vmem_to_hbm [thread:$0]  (%p1327_p6), %s1463_s11, 256, %s1461_s28, %s702_s30, %s1169_s12, %s1169_s12, %s1170_s13  }
 0x4b6 PF: > { %p941_p13 = scmp.ge.s32.totalorder %s1159_s26, 2  ;;  %s730_s14 = sand.u32 1, %s1147_s23  }
 0x4b7   : > { %p1528_p3 = scmp.ne.s32.totalorder %s1517_s29, 0  ;;  %s731_s20 = scalar_lea.sflag [#allocation5], %s730_s14 }
 0x4b9   : > { %p933_p7 = pnand %p941_p13, %p1528_p3 }
 0x4bb   : > { %1142 = dma.done.wait (!%p933_p7), %s731_s20, 256  }
 0x4bc   : > { %1144 = vsyncadd (!%p933_p7), %s731_s20, 4294967040  ;;  %p21_p9 = scmp.ge.s32.totalorder %s1317_s9, 6   ;;  %s1529_s23 = smov %s1151_s24 }
 0x4bd   : > { %s1530_s24 = smov %s1155_s25  ;;  %s1531_s25 = smov %s1333_s7 }
 0x4be   : > { %s1532_s26 = smov %s1317_s9  ;;  %23 = sbr.rel (!%p21_p9) target bundleno = 8 (0x8), region = 100 }
 0x4c5   :  { %736 = vsyncpa [#allocation4], 1 }
 0x4c6   :  { %738 = vsyncpa [#allocation4 + $0x1], 1 }
 0x4c7   :  { %739 = vsyncpa [#allocation7], 1 }
 0x4c8   :  { %740 = vsyncpa [#allocation5], 1 }
 0x4c9   :  { %742 = vsyncpa [#allocation5 + $0x1], 1 }

// kernel: tpu_custom_call.1
= control target key start
LH: loop header
LB: loop body
LE: loop exit
PB: predicated region body
PF: predicated region fallthrough
CT: control target
= control target key end

     0   :  { %s1506_s0 = inlined_call_operand.hbm [shape: f32[64,256], index: 0, kind: input, shape index: {}]   ;;  %s1507_s1 = inlined_call_operand.vmem [shape: f32[64,1], index: 1, kind: input, shape index: {}]   ;;  %s1508_s2 = inlined_call_operand.hbm [shape: f32[128,256], index: 2, kind: input, shape index: {}]   ;;  %s1509_s3 = inlined_call_operand.hbm [shape: f32[128,256], index: 3, kind: input, shape index: {}]   ;;  %s1510_s4 = inlined_call_operand.vmem [shape: f32[8,128], index: 4, kind: input, shape index: {}]   ;;  %s1511_s5 = inlined_call_operand.<no memory space> [shape: f32[1,1], index: 5, kind: input, shape index: {}]   ;;  %s1512_s6 = inlined_call_operand.hbm [shape: f32[64,128], index: 6, kind: output, shape index: {}]  }
   0x1   :  { %11 = sst [smem:[#allocation2]] %s1511_s5 }
   0x2   :  { %12 = vsyncpa [#allocation4], 0 }
   0x3   :  { %14 = vsyncpa [#allocation4 + $0x1], 0 }
   0x4   :  { %15 = vsyncpa [#allocation7], 0 }
   0x5   :  { %16 = vsyncpa [#allocation5], 0 }
   0x6   :  { %18 = vsyncpa [#allocation5 + $0x1], 0  ;;  %s1209_s23 = smov 0   ;;  %s1211_s24 = smov 0  }
   0x7   :  { %s1213_s25 = smov 0   ;;  %s1215_s26 = smov 0  }
   0x8 LB: > { %s1230_s5 = sadd.s32 4294967295, %s1159_s26   ;;  %s819_s27 = sadd.s32 4294967294, %s1159_s26   ;;  %s1159_s26 = sphi %s1215_s26, %s1532_s26   ;;  %s1155_s25 = sphi %s1213_s25, %s1531_s25   ;;  %s1151_s24 = sphi %s1211_s24, %s1530_s24   ;;  %s1147_s23 = sphi %s1209_s23, %s1529_s23  }
   0x9   : > { %p44_p0 = scmp.ne.s32.totalorder %s1151_s24, %s1147_s23  ;;  %p1513_p1 = scmp.eq.s32.totalorder %s1230_s5, 0 }
   0xa   : > { %p184_p3 = scmp.eq.s32.totalorder %s819_s27, 3  ;;  %p820_p5 = scmp.ge.s32.totalorder %s1159_s26, 1 }
   0xb   : > { %p1239_p4 = por %p1513_p1, %p44_p0  ;;  %p191_p7 = scmp.lt.s32.totalorder %s1159_s26, 5 }
   0xc   : > { %p1244_p6 = por %p184_p3, %p44_p0  ;;  %s1161_s7 = smov [#allocation6]  }
   0xd   : > { %s1516_s28 = scalar_select %p1239_p4, 1, 0 }
   0xe   : > { %s1517_s29 = scalar_select %p1244_p6, 1, 0 }
   0xf   : > { %p1249_p8 = pnand %p820_p5, %p191_p7  ;;  %s203_s8 = sshll.u32 %s1161_s7, 4  ;;  %s204_s8 = int_to_ptr.vmem [resolvable:$true] %s203_s8 }
  0x10   : > { %s1162_s10 = smov [#allocation8]   ;;  %s1003_s14 = scalar_lea.hbm %s1508_s2, 4096 }
  0x11   : > { %s1518_s30 = scalar_select %p1249_p8, 1, 0 }
  0x12   : > { %p921_p9 = pneg %p1249_p8  ;;  %s216_s11 = sshll.u32 %s1162_s10, 4  ;;  %s1261_s11 = int_to_ptr.vmem [resolvable:$true] %s216_s11 }
  0x13   : > { %p1004_p11 = scmp.ne.s32.totalorder %s1508_s2, %s1003_s14  ;;  %p1010_p3 = scmp.lt.u32.totalorder %s1003_s14, %s1508_s2 }
  0x14   : > { %p1257_p10 = pnand %p921_p9, %p1513_p1 }
  0x16   : > { %p1005_p12 = pneg %p1257_p10 }
  0x18   : > { %p1006_p13 = pnand %p1005_p12, %p1004_p11 }
  0x1a   : > { %p1007_p0 = pneg %p1006_p13 }
  0x1c   : > { %p1012_p5 = pnand %p1010_p3, %p1007_p0 }
  0x1e   : > { %1015 = shalt.err (!%p1012_p5)
}
  0x1f   : > { %s1016_s19 = scalar_lea.vmem %s204_s8, 4096  ;;  %p1024_p2 = scmp.lt.s32.totalorder %s204_s8, %s204_s8 }
  0x20   : > { %p1017_p7 = scmp.ne.s32.totalorder %s204_s8, %s1016_s19  ;;  %p1025_p6 = scmp.lt.s32.totalorder %s1016_s19, %s1016_s19 }
  0x22   : > { %p1019_p9 = pnand %p1017_p7, %p1005_p12  ;;  %p1026_p4 = por %p1025_p6, %p1024_p2 }
  0x24   : > { %p1020_p1 = pneg %p1019_p9 }
  0x26   : > { %p1027_p8 = pnand %p1026_p4, %p1020_p1 }
  0x28   : > { %1030 = shalt.err (!%p1027_p8)
}
  0x29   : > { %s1163_s20 = smov 256   ;;  %s1164_s21 = smov 16  }
  0x2a   : > { %924 = dma.hbm_to_vmem [thread:$0]  (!%p1257_p10), %s1508_s2, 4096, %s204_s8, [#allocation7], %s1163_s20, %s1163_s20, %s1164_s21  }
  0x2b   : > { %s1031_s12 = scalar_lea.hbm %s1509_s3, 4096 }
  0x2c   : > { %p1032_p1 = scmp.ne.s32.totalorder %s1509_s3, %s1031_s12  ;;  %p1038_p6 = scmp.lt.u32.totalorder %s1031_s12, %s1509_s3 }
  0x2e   : > { %p1034_p2 = pnand %p1032_p1, %p1005_p12 }
  0x30   : > { %p1035_p4 = pneg %p1034_p2 }
  0x32   : > { %p1040_p8 = pnand %p1038_p6, %p1035_p4 }
  0x34   : > { %1043 = shalt.err (!%p1040_p8)
}
  0x35   : > { %s1044_s8 = scalar_lea.vmem %s1261_s11, 4096  ;;  %p1052_p3 = scmp.lt.s32.totalorder %s1261_s11, %s1261_s11 }
  0x36   : > { %p1045_p11 = scmp.ne.s32.totalorder %s1261_s11, %s1044_s8  ;;  %p1053_p5 = scmp.lt.s32.totalorder %s1044_s8, %s1044_s8 }
  0x38   : > { %p1047_p13 = pnand %p1045_p11, %p1005_p12  ;;  %p1054_p7 = por %p1053_p5, %p1052_p3 }
  0x3a   : > { %p1048_p0 = pneg %p1047_p13 }
  0x3c   : > { %p1055_p9 = pnand %p1054_p7, %p1048_p0 }
  0x3e   : > { %1058 = shalt.err (!%p1055_p9)
}
  0x3f   : > { %927 = dma.hbm_to_vmem [thread:$0]  (!%p1257_p10), %s1509_s3, 4096, %s1261_s11, [#allocation7], %s1163_s20, %s1163_s20, %s1164_s21  }
  0x40   : > { %s1317_s9 = sadd.s32 1, %s1159_s26   ;;  %s31_s19 = sadd.s32 1, %s1155_s25 }
  0x41   : > { %s28_s22 = ssub.s32 %s1159_s26, %s1317_s9  ;;  %p38_p12 = scmp.ne.s32.totalorder %s1155_s25, %s1151_s24 }
  0x42   : > { %p29_p1 = scmp.eq.s32.totalorder %s28_s22, 0  ;;  %p39_p2 = scmp.eq.s32.totalorder %s1159_s26, 0 }
  0x43   : > { %p1520_p4 = scmp.eq.s32.totalorder %s1230_s5, 3  ;;  %p938_p8 = scmp.lt.s32.totalorder %s1159_s26, 4 }
  0x44   : > { %s1333_s7 = scalar_select %p29_p1, %s1155_s25, %s31_s19  }
  0x45   : > { %p1327_p6 = por %p1520_p4, %p38_p12  ;;  %p40_p11 = por %p39_p2, %p38_p12 }
  0x46   : > { %s236_s10 = sand.u32 1, %s1155_s25   ;;  %s843_s11 = sshll.u32 %s1159_s26, 9 }
  0x47   : > { %s824_s12 = sshll.u32 %s236_s10, 5  ;;  %s1340_s15 = scalar_lea.hbm %s1506_s0, %s843_s11 }
  0x48   : > { %s240_s16 = scalar_lea.vmem [#allocation3], %s824_s12  ;;  %p1344_p10 = pnand %p938_p8, %p40_p11 }
  0x49   : > { %s248_s8 = sshll.u32 %s240_s16, 4  ;;  %s1348_s18 = scalar_lea.sflag [#allocation4], %s236_s10  ;;  %s1342_s8 = int_to_ptr.vmem [resolvable:$true] %s248_s8 }
  0x4a   : > { %s1059_s19 = scalar_lea.hbm %s1340_s15, 512  ;;  %p1061_p0 = pneg %p1344_p10 }
  0x4b   : > { %p1060_p13 = scmp.ne.s32.totalorder %s1340_s15, %s1059_s19  ;;  %s1064_s11 = scalar_lea.hbm %s1506_s0, 2048 }
  0x4c   : > { %p1065_p7 = scmp.lt.u32.totalorder %s1340_s15, %s1506_s0  ;;  %p1066_p9 = scmp.lt.u32.totalorder %s1064_s11, %s1059_s19 }
  0x4d   : > { %p1062_p3 = pnand %p1061_p0, %p1060_p13  ;;  %p1068_p1 = scmp.lt.u32.totalorder %s1059_s19, %s1340_s15 }
  0x4e   : > { %p1067_p12 = por %p1066_p9, %p1065_p7 }
  0x4f   : > { %p1063_p5 = pneg %p1062_p3 }
  0x50   : > { %p1069_p2 = por %p1068_p1, %p1067_p12 }
  0x52   : > { %p1070_p4 = pnand %p1069_p2, %p1063_p5 }
  0x54   : > { %1073 = shalt.err (!%p1070_p4)
}
  0x55   : > { %s1074_s10 = scalar_lea.vmem %s1342_s8, 512  ;;  %s1165_s16 = smov [#allocation3]  }
  0x56   : > { %p1075_p8 = scmp.ne.s32.totalorder %s1342_s8, %s1074_s10  ;;  %s1079_s22 = sshll.u32 %s1165_s16, 4  ;;  %s1080_s22 = int_to_ptr.vmem [resolvable:$false] %s1079_s22 }
  0x57   : > { %s1081_s12 = scalar_lea.vmem %s1080_s22, 1024  ;;  %p1082_p3 = scmp.lt.s32.totalorder %s1342_s8, %s1080_s22 }
  0x58   : > { %p1077_p11 = pnand %p1075_p8, %p1061_p0  ;;  %p1083_p7 = scmp.lt.s32.totalorder %s1081_s12, %s1074_s10 }
  0x5a   : > { %p1078_p13 = pneg %p1077_p11  ;;  %p1084_p9 = por %p1083_p7, %p1082_p3 }
  0x5c   : > { %p1085_p12 = pnand %p1084_p9, %p1078_p13 }
  0x5e   : > { %1088 = shalt.err (!%p1085_p12)
}
  0x5f   : > { %931 = dma.hbm_to_vmem [thread:$0]  (!%p1344_p10), %s1340_s15, 512, %s1342_s8, %s1348_s18, %s1163_s20, %s1163_s20, %s1164_s21  }
  0x60   : > { %p1523_p0 = scmp.ne.s32.totalorder %s1518_s30, 0 }
  0x61   : > { %s1382_s19 = sand.u32 (!%p1523_p0), 1, %s1151_s24   ;;  %p1524_p5 = scmp.ne.s32.totalorder (!%p1523_p0), %s1516_s28, 0 }
  0x62   : > { %269 = sbr.rel (%p1523_p0) target bundleno = 1206 (0x4b6), region = 44  ;;  %s829_s11 = sshll.u32 (!%p1523_p0), %s1382_s19, 5 }
  0x63   : > { %s272_s13 = scalar_lea.sflag (!%p1523_p0), [#allocation4], %s1382_s19  ;;  %s1386_s14 = scalar_lea.vmem (!%p1523_p0), [#allocation3], %s829_s11 }
  0x69   : > { %1134 = dma.done.wait (%p1524_p5), %s272_s13, 512  }
  0x6a   : > { %1136 = vsyncadd (%p1524_p5), %s272_s13, 4294966784  ;;  %p1525_p10 = scmp.eq.s32.totalorder %s1230_s5, 0 }
  0x6c   : > { %1138 = dma.done.wait (%p1525_p10), [#allocation7], 8192   ;;  %p1526_p1 = pmov %p1525_p10 }
  0x6d   : > { %v1166_v0 = vmov 0.0   ;;  %v1167_v1 = vmov 0   ;;  %v333_v2 = vld [vmem:[#allocation6 + $0x8] sm:$0xff]  ;;  %v335_v3 = vld [vmem:[#allocation6 + $0x18] sm:$0xff]  ;;  %v332_v7 = vld [vmem:[#allocation6] sm:$0xff]  ;;  %s833_s28 = sshll.u32 %s1230_s5, 1 }
  0x6e   : > { %1140 = vsyncadd (%p1526_p1), [#allocation7], 4294959104  ;;  %428 = vmatprep.mubr.f32.mxu0 %v1166_v0  ;;  %537 = vmatprep.mubr.f32.mxu1 %v1166_v0  ;;  %v442_v4 = vld [vmem:[#allocation8 + $0x8] sm:$0xff]  ;;  %v845_v5 = vpack.c.bf16 %v335_v3, %v333_v2  ;;  %v444_v6 = vld [vmem:[#allocation8 + $0x18] sm:$0xff]  ;;  %p1401_p2 = scmp.lt.s32.totalorder %s833_s28, 7  ;;  %s631_s10 = sld [smem:[#allocation2]] }
  0x6f   : > { %982 = vset.pattern.permute.xlu0 %v1167_v1  ;;  %v334_v8 = vld [vmem:[#allocation6 + $0x10] sm:$0xff]  ;;  %v877_v9 = vpack.c.bf16 %v444_v6, %v442_v4  ;;  %v441_v11 = vld [vmem:[#allocation8] sm:$0xff]  ;;  %v337_v13 = vld [vmem:[#allocation6 + $0x28] sm:$0xff]  ;;  %s832_s16 = sshll.u32 %s1382_s19, 4  ;;  %s844_s22 = sshll.u32 %s1230_s5, 8 }
  0x70   : > { %v847_v10 = vpack.c.bf16 %v334_v8, %v332_v7  ;;  %v443_v12 = vld [vmem:[#allocation8 + $0x10] sm:$0xff]  ;;  %846 = vmatprep.subr.bf16.mxu0 %v845_v5  ;;  %v339_v15 = vld [vmem:[#allocation6 + $0x38] sm:$0xff]  ;;  %v446_v16 = vld [vmem:[#allocation8 + $0x28] sm:$0xff]  ;;  %s1534_s28 = smov (!%p1401_p2, %s833_s28), 7  ;;  %s316_s12 = scalar_lea.vmem [#allocation9], %s832_s16 }
  0x71   : > { %v879_v14 = vpack.c.bf16 %v443_v12, %v441_v11  ;;  %v448_v17 = vld [vmem:[#allocation8 + $0x38] sm:$0xff]  ;;  %878 = vmatprep.subr.bf16.mxu1 %v877_v9  ;;  %v849_v18 = vpack.c.bf16 %v339_v15, %v337_v13  ;;  %v336_v20 = vld [vmem:[#allocation6 + $0x20] sm:$0xff]  ;;  %v338_v21 = vld [vmem:[#allocation6 + $0x30] sm:$0xff]  ;;  %s834_s20 = sshll.u32 %s1534_s28, 3  ;;  %s715_s11 = sshll.u32 %s316_s12, 4  ;;  %s1463_s11 = int_to_ptr.vmem [resolvable:$true] %s715_s11 }
  0x72   : > { %848 = vmatpush1.bf16.msra.mxu0 %v847_v10  ;;  %v881_v19 = vpack.c.bf16 %v448_v17, %v446_v16  ;;  %v445_v22 = vld [vmem:[#allocation8 + $0x20] sm:$0xff]  ;;  %v851_v23 = vpack.c.bf16 %v338_v21, %v336_v20  ;;  %v447_v24 = vld [vmem:[#allocation8 + $0x30] sm:$0xff]  ;;  %v341_v25 = vld [vmem:[#allocation6 + $0x48] sm:$0xff]  ;;  %s322_s8 = scalar_lea.vmem %s1507_s1, %s834_s20  ;;  %s1461_s28 = scalar_lea.hbm %s1512_s6, %s844_s22 }
  0x73   : > { %880 = vmatpush1.bf16.msra.mxu1 %v879_v14  ;;  %v343_v26 = vld [vmem:[#allocation6 + $0x58] sm:$0xff]  ;;  %850 = vmatprep.subr.bf16.mxu0 %v849_v18  ;;  %v883_v27 = vpack.c.bf16 %v447_v24, %v445_v22  ;;  %v450_v29 = vld [vmem:[#allocation8 + $0x48] sm:$0xff]  ;;  %v340_v31 = vld [vmem:[#allocation6 + $0x40] sm:$0xff]  ;;  %s702_s30 = scalar_lea.sflag [#allocation5], %s1382_s19  ;;  %s1089_s20 = scalar_lea.vmem %s1463_s11, 256 }
  0x74   : > { %882 = vmatprep.subr.bf16.mxu1 %v881_v19  ;;  %v853_v28 = vpack.c.bf16 %v343_v26, %v341_v25  ;;  %v452_v30 = vld [vmem:[#allocation8 + $0x58] sm:$0xff]  ;;  %v342_v33 = vld [vmem:[#allocation6 + $0x50] sm:$0xff]  ;;  %v449_v34 = vld [vmem:[#allocation8 + $0x40] sm:$0xff]  ;;  %p1090_p4 = scmp.ne.s32.totalorder %s1463_s11, %s1089_s20  ;;  %s1168_s5 = smov [#allocation9]  }
  0x75   : > { %v885_v32 = vpack.c.bf16 %v452_v30, %v450_v29  ;;  %v451_v35 = vld [vmem:[#allocation8 + $0x50] sm:$0xff]  ;;  %v855_v36 = vpack.c.bf16 %v342_v33, %v340_v31  ;;  %v345_v37 = vld [vmem:[#allocation6 + $0x68] sm:$0xff]  ;;  %v347_v38 = vld [vmem:[#allocation6 + $0x78] sm:$0xff]  ;;  %s1093_s21 = sshll.u32 %s1168_s5, 4  ;;  %s1094_s21 = int_to_ptr.vmem [resolvable:$false] %s1093_s21 }
  0x76   : > { %852 = vmatpush1.bf16.msra.mxu0 %v851_v23  ;;  %v454_v39 = vld [vmem:[#allocation8 + $0x68] sm:$0xff]  ;;  %v887_v40 = vpack.c.bf16 %v451_v35, %v449_v34  ;;  %v857_v41 = vpack.c.bf16 %v347_v38, %v345_v37  ;;  %v456_v42 = vld [vmem:[#allocation8 + $0x78] sm:$0xff]  ;;  %v344_v43 = vld [vmem:[#allocation6 + $0x60] sm:$0xff]  ;;  %p1091_p8 = pnand %p1090_p4, %p1327_p6  ;;  %s1095_s15 = scalar_lea.vmem %s1094_s21, 512 }
  0x77   : > { %884 = vmatpush1.bf16.msra.mxu1 %v883_v27  ;;  %854 = vmatprep.subr.bf16.mxu0 %v853_v28  ;;  %v346_v44 = vld [vmem:[#allocation6 + $0x70] sm:$0xff]  ;;  %v889_v45 = vpack.c.bf16 %v456_v42, %v454_v39  ;;  %v453_v46 = vld [vmem:[#allocation8 + $0x60] sm:$0xff]  ;;  %v349_v48 = vld [vmem:[#allocation6 + $0x88] sm:$0xff]  ;;  %p1096_p13 = scmp.lt.s32.totalorder %s1463_s11, %s1094_s21  ;;  %p1097_p3 = scmp.lt.s32.totalorder %s1095_s15, %s1089_s20 }
  0x78   : > { %886 = vmatprep.subr.bf16.mxu1 %v885_v32  ;;  %v455_v47 = vld [vmem:[#allocation8 + $0x70] sm:$0xff]  ;;  %v351_v49 = vld [vmem:[#allocation6 + $0x98] sm:$0xff]  ;;  %v458_v50 = vld [vmem:[#allocation8 + $0x88] sm:$0xff]  ;;  %v859_v52 = vpack.c.bf16 %v346_v44, %v344_v43  ;;  %p1092_p11 = pneg %p1091_p8 }
  0x79   : > { %v460_v51 = vld [vmem:[#allocation8 + $0x98] sm:$0xff]  ;;  %v891_v53 = vpack.c.bf16 %v455_v47, %v453_v46  ;;  %v861_v54 = vpack.c.bf16 %v351_v49, %v349_v48  ;;  %v348_v55 = vld [vmem:[#allocation6 + $0x80] sm:$0xff]  ;;  %v350_v56 = vld [vmem:[#allocation6 + $0x90] sm:$0xff]  ;;  %p1098_p7 = por %p1097_p3, %p1096_p13 }
  0x7a   : > { %856 = vmatpush1.bf16.msra.mxu0 %v855_v36  ;;  %v457_v57 = vld [vmem:[#allocation8 + $0x80] sm:$0xff]  ;;  %v893_v58 = vpack.c.bf16 %v460_v51, %v458_v50  ;;  %v459_v59 = vld [vmem:[#allocation8 + $0x90] sm:$0xff]  ;;  %v353_v60 = vld [vmem:[#allocation6 + $0xa8] sm:$0xff]  ;;  %v863_v1 = vpack.c.bf16 %v350_v56, %v348_v55 }
  0x7b   : > { %888 = vmatpush1.bf16.msra.mxu1 %v887_v40  ;;  %858 = vmatprep.subr.bf16.mxu0 %v857_v41  ;;  %v355_v61 = vld [vmem:[#allocation6 + $0xb8] sm:$0xff]  ;;  %v462_v62 = vld [vmem:[#allocation8 + $0xa8] sm:$0xff]  ;;  %v895_v2 = vpack.c.bf16 %v459_v59, %v457_v57  ;;  %v352_v4 = vld [vmem:[#allocation6 + $0xa0] sm:$0xff]  ;;  %v562_v41 = vlaneseq  ;;  %p1099_p9 = pnand %p1098_p7, %p1092_p11 }
  0x7c   : > { %890 = vmatprep.subr.bf16.mxu1 %v889_v45  ;;  %v464_v63 = vld [vmem:[#allocation8 + $0xb8] sm:$0xff]  ;;  %v865_v3 = vpack.c.bf16 %v355_v61, %v353_v60  ;;  %v354_v5 = vld [vmem:[#allocation6 + $0xb0] sm:$0xff]  ;;  %v461_v6 = vld [vmem:[#allocation8 + $0xa0] sm:$0xff] }
  0x7d   : > { %v897_v7 = vpack.c.bf16 %v464_v63, %v462_v62  ;;  %v463_v8 = vld [vmem:[#allocation8 + $0xb0] sm:$0xff]  ;;  %v357_v9 = vld [vmem:[#allocation6 + $0xc8] sm:$0xff]  ;;  %v359_v10 = vld [vmem:[#allocation6 + $0xd8] sm:$0xff]  ;;  %v867_v13 = vpack.c.bf16 %v354_v5, %v352_v4  ;;  %v1421_v42 = vshrl.u32 %v562_v41, 7 }
  0x7e   : > { %860 = vmatpush1.bf16.msra.mxu0 %v859_v52  ;;  %v466_v11 = vld [vmem:[#allocation8 + $0xc8] sm:$0xff]  ;;  %v468_v12 = vld [vmem:[#allocation8 + $0xd8] sm:$0xff]  ;;  %v356_v14 = vld [vmem:[#allocation6 + $0xc0] sm:$0xff]  ;;  %v899_v15 = vpack.c.bf16 %v463_v8, %v461_v6  ;;  %v869_v16 = vpack.c.bf16 %v359_v10, %v357_v9 }
  0x7f   : > { %892 = vmatpush1.bf16.msra.mxu1 %v891_v53  ;;  %862 = vmatprep.subr.bf16.mxu0 %v861_v54  ;;  %v358_v17 = vld [vmem:[#allocation6 + $0xd0] sm:$0xff]  ;;  %v465_v18 = vld [vmem:[#allocation8 + $0xc0] sm:$0xff]  ;;  %v901_v20 = vpack.c.bf16 %v468_v12, %v466_v11  ;;  %v361_v21 = vld [vmem:[#allocation6 + $0xe8] sm:$0xff]  ;;  %v564_v43 = vsub.s32 0, %v1421_v42  ;;  %v572_v47 = vsub.s32 1, %v1421_v42 }
  0x80   : > { %894 = vmatprep.subr.bf16.mxu1 %v893_v58  ;;  %v467_v19 = vld [vmem:[#allocation8 + $0xd0] sm:$0xff]  ;;  %v363_v22 = vld [vmem:[#allocation6 + $0xf8] sm:$0xff]  ;;  %v329_v23 = vld [vmem:[%s322_s8] sm:$0xff]  ;;  %v871_v26 = vpack.c.bf16 %v358_v17, %v356_v14  ;;  %v607_v17 = vsub.s32 3, %v1421_v42 }
  0x81   : > { %v470_v24 = vld [vmem:[#allocation8 + $0xe8] sm:$0xff]  ;;  %v472_v25 = vld [vmem:[#allocation8 + $0xf8] sm:$0xff]  ;;  %554 = vperm.xlu0 %982, %v329_v23   ;;  %v903_v28 = vpack.c.bf16 %v467_v19, %v465_v18  ;;  %v873_v29 = vpack.c.bf16 %v363_v22, %v361_v21  ;;  %v360_v30 = vld [vmem:[#allocation6 + $0xe0] sm:$0xff] }
  0x82   : > { %864 = vmatpush1.bf16.msra.mxu0 %v863_v1  ;;  %v330_v27 = vld [vmem:[%s322_s8 + $0x8] sm:$0xff]  ;;  %v362_v31 = vld [vmem:[#allocation6 + $0xf0] sm:$0xff]  ;;  %v905_v32 = vpack.c.bf16 %v472_v25, %v470_v24  ;;  %v469_v33 = vld [vmem:[#allocation8 + $0xe0] sm:$0xff] }
  0x83   : > { %896 = vmatpush1.bf16.msra.mxu1 %v895_v2  ;;  %866 = vmatprep.subr.bf16.mxu0 %v865_v3  ;;  %v471_v34 = vld [vmem:[#allocation8 + $0xf0] sm:$0xff]  ;;  %v875_v35 = vpack.c.bf16 %v362_v31, %v360_v30  ;;  %v325_v37 = vld [vmem:[%s1386_s14] sm:$0xff]  ;;  %v326_v38 = vld [vmem:[%s1386_s14 + $0x8] sm:$0xff]  ;;  %v623_v30 = vsub.s32 4, %v1421_v42 }
  0x84   : > { %898 = vmatprep.subr.bf16.mxu1 %v897_v7  ;;  %v907_v36 = vpack.c.bf16 %v471_v34, %v469_v33  ;;  %v327_v39 = vld [vmem:[%s1386_s14 + $0x10] sm:$0xff]  ;;  %v328_v40 = vld [vmem:[%s1386_s14 + $0x18] sm:$0xff]  ;;  %v1427_v44 = vld [vmem:[%s1510_s4] sm:$0xff] }
  0x85   : > { %559 = vperm.xlu0 %982, %v330_v27   ;;  %v565_v45 = vrot.slane %v1427_v44, %v564_v43  ;;  %v573_v53 = vrot.slane %v1427_v44, %v572_v47  ;;  %v608_v21 = vrot.slane %v1427_v44, %v607_v17  ;;  %v624_v34 = vrot.slane %v1427_v44, %v623_v30 }
  0x86   : > { %868 = vmatpush1.bf16.msra.mxu0 %v867_v13  ;;  %v632_v43 = vstv %s631_s10 }
  0x87   : > { %900 = vmatpush1.bf16.msra.mxu1 %v899_v15  ;;  %870 = vmatprep.subr.bf16.mxu0 %v869_v16  ;;  %v601_v16 = vsub.s32 2, %v1421_v42 }
  0x88   : > { %902 = vmatprep.subr.bf16.mxu1 %v901_v20 }
  0x89   : > { %v602_v18 = vrot.slane %v1427_v44, %v601_v16 }
  0x8a   : > { %872 = vmatpush1.bf16.msra.mxu0 %v871_v26 }
  0x8b   : > { %904 = vmatpush1.bf16.msra.mxu1 %v903_v28  ;;  %874 = vmatprep.subr.bf16.mxu0 %v873_v29 }
  0x8c   : > { %906 = vmatprep.subr.bf16.mxu1 %v905_v32 }
  0x8e   : > { %876 = vmatpush1.bf16.msra.mxu0 %v875_v35 }
  0x8f   : > { %908 = vmatpush1.bf16.msra.mxu1 %v907_v36 }
  0x91   : > { %429 = vmatmul.mubr.f32.vlgmr.msra.gmra.mrb[0].mxu0 %v325_v37 }
  0x92   : > { %538 = vmatmul.mubr.f32.vlgmr.msra.gmra.mrb[0].mxu1 %v326_v38  ;;  %434 = vmatprep.mubr.f32.mxu0 %v1166_v0 }
  0x93   : > { %543 = vmatprep.mubr.f32.mxu1 %v1166_v0 }
  0x95   : > { %435 = vmatmul.mubr.f32.gmra.mrb[2].mxu0 %v327_v39 }
  0x96   : > { %544 = vmatmul.mubr.f32.gmra.mrb[2].mxu1 %v328_v40 }
 0x100   : > { %v555_v46 = vpop.permute.xlu0 %554 }
 0x101   : > { %v566_v48 = vmul.f32 %v565_v45, %v555_v46 }
 0x104   : > { %v560_v54 = vpop.permute.xlu0 %559 }
 0x105   : > { %v567_v59 = vmul.f32 %v565_v45, %v560_v54 }
 0x164   : > { %v430_v0 = vpop.f32.mrb[0].mxu0 }
 0x165   : > { %v539_v49 = vpop.f32.mrb[0].mxu1  ;;  %v1431_v50 = vpop.f32.mrb[1].mxu0 }
 0x166   : > { %v550_v51 = vadd.f32 %v539_v49, %v430_v0  ;;  %v1433_v52 = vpop.f32.mrb[1].mxu1 }
 0x168   : > { %v568_v55 = vadd.f32 %v566_v48, %v550_v51  ;;  %v436_v56 = vpop.f32.mrb[2].mxu0 }
 0x169   : > { %v545_v57 = vpop.f32.mrb[2].mxu1  ;;  %v1436_v58 = vpop.f32.mrb[3].mxu0 }
 0x16a   : > { %v551_v60 = vadd.f32 %v545_v57, %v436_v56  ;;  %v1438_v61 = vpop.f32.mrb[3].mxu1  ;;  %v574_v62 = vadd.f32 %v573_v53, %v568_v55 }
 0x16c   : > { %v569_v63 = vadd.f32 %v567_v59, %v551_v60  ;;  %576 = vadd.xlane.f32.xlu1 %v574_v62  ;;  %v661_v60 = vsub.s32 5, %v1421_v42 }
 0x16e   : > { %v575_v1 = vadd.f32 %v573_v53, %v569_v63 }
 0x170   : > { %578 = vadd.xlane.f32.xlu1 %v575_v1 }
 0x1f9   : > { %v577_v2 = vpop.xlane.xlu1 %576 }
 0x1fa   : > { %v581_v3 = vmul.f32 0.0078125, %v577_v2 }
 0x1fc   : > { %v583_v4 = vsub.f32 %v574_v62, %v581_v3 }
 0x1fd   : > { %v579_v5 = vpop.xlane.xlu1 %578 }
 0x1fe   : > { %v582_v6 = vmul.f32 0.0078125, %v579_v5  ;;  %v585_v7 = vmul.f32 %v583_v4, %v583_v4 }
 0x200   : > { %v584_v8 = vsub.f32 %v575_v1, %v582_v6  ;;  %587 = vadd.xlane.f32.xlu0 %v585_v7 }
 0x202   : > { %v586_v9 = vmul.f32 %v584_v8, %v584_v8 }
 0x204   : > { %589 = vadd.xlane.f32.xlu1 %v586_v9 }
 0x28d   : > { %v588_v10 = vpop.xlane.xlu0 %587 }
 0x28e   : > { %v591_v11 = vmul.f32 0.0078125, %v588_v10 }
 0x290   : > { %v593_v12 = vadd.f32 1e-05, %v591_v11 }
 0x291   : > { %v590_v13 = vpop.xlane.xlu1 %589 }
 0x292   : > { %983 = vrsqrt.f32 %v593_v12  ;;  %v592_v14 = vmul.f32 0.0078125, %v590_v13 }
 0x294   : > { %v594_v15 = vadd.f32 1e-05, %v592_v14 }
 0x296   : > { %985 = vrsqrt.f32 %v594_v15 }
 0x29c   : > { %v984_v19 = vpop.eup %983 }
 0x29d   : > { %v597_v20 = vmul.f32 %v984_v19, %v583_v4  ;;  %v662_v4 = vrot.slane %v1427_v44, %v661_v60 }
 0x29f   : > { %v603_v22 = vmul.f32 %v602_v18, %v597_v20 }
 0x2a0   : > { %v986_v23 = vpop.eup %985 }
 0x2a1   : > { %v609_v24 = vadd.f32 %v608_v21, %v603_v22  ;;  %v598_v25 = vmul.f32 %v986_v23, %v584_v8  ;;  %v689_v23 = vsub.s32 6, %v1421_v42 }
 0x2a3   : > { %v613_v26 = vmul.f32 0.70710677, %v609_v24  ;;  %v604_v27 = vmul.f32 %v602_v18, %v598_v25  ;;  %v611_v32 = vmul.f32 0.5, %v609_v24  ;;  %v695_v24 = vsub.s32 7, %v1421_v42 }
 0x2a4   : > { %v690_v25 = vrot.slane %v1427_v44, %v689_v23 }
 0x2a5   : > { %987 = verf.f32 %v613_v26  ;;  %v610_v28 = vadd.f32 %v608_v21, %v604_v27  ;;  %v696_v27 = vrot.slane %v1427_v44, %v695_v24 }
 0x2a7   : > { %v614_v29 = vmul.f32 0.70710677, %v610_v28  ;;  %v612_v38 = vmul.f32 0.5, %v610_v28 }
 0x2a9   : > { %989 = verf.f32 %v614_v29 }
 0x2af   : > { %v988_v31 = vpop.eup %987 }
 0x2b0   : > { %v617_v33 = vadd.f32 1.0, %v988_v31 }
 0x2b2   : > { %v619_v35 = vmul.f32 %v617_v33, %v611_v32 }
 0x2b3   : > { %v990_v36 = vpop.eup %989 }
 0x2b4   : > { %v625_v37 = vmul.f32 %v624_v34, %v619_v35  ;;  %v618_v39 = vadd.f32 1.0, %v990_v36 }
 0x2b6   : > { %627 = vadd.xlane.f32.xlu1 %v625_v37  ;;  %v620_v40 = vmul.f32 %v618_v39, %v612_v38 }
 0x2b8   : > { %v626_v41 = vmul.f32 %v624_v34, %v620_v40 }
 0x2ba   : > { %629 = vadd.xlane.f32.xlu1 %v626_v41 }
 0x343   : > { %v628_v45 = vpop.xlane.xlu1 %627 }
 0x344   : > { %v633_v46 = vadd.f32 %v632_v43, %v628_v45 }
 0x346   : > { %v835_v47 = vmul.f32 -1.442695, %v633_v46 }
 0x347   : > { %v630_v48 = vpop.xlane.xlu1 %629 }
 0x348   : > { %991 = vpow2.f32 %v835_v47  ;;  %v634_v0 = vadd.f32 %v632_v43, %v630_v48 }
 0x34a   : > { %v836_v49 = vmul.f32 -1.442695, %v634_v0 }
 0x34c   : > { %993 = vpow2.f32 %v836_v49 }
 0x352   : > { %v992_v51 = vpop.eup %991 }
 0x353   : > { %v641_v53 = vadd.f32 1.0, %v992_v51 }
 0x355   : > { %995 = vrcp.f32 %v641_v53 }
 0x356   : > { %v994_v54 = vpop.eup %993 }
 0x357   : > { %v642_v55 = vadd.f32 1.0, %v994_v54 }
 0x359   : > { %997 = vrcp.f32 %v642_v55 }
 0x35f   : > { %v996_v56 = vpop.eup %995 }
 0x360   : > { %v647_v57 = vmul.f32 0.3, %v996_v56 }
 0x362   : > { %v649_v59 = vadd.f32 0.7, %v647_v57 }
 0x363   : > { %v998_v62 = vpop.eup %997 }
 0x364   : > { %v648_v63 = vmul.f32 0.3, %v998_v62  ;;  %v651_v1 = vsub.f32 1.0, %v649_v59  ;;  %v653_v2 = vmul.f32 %v649_v59, %v1431_v50 }
 0x366   : > { %v655_v3 = vmul.f32 %v651_v1, %v1433_v52  ;;  %v650_v5 = vadd.f32 0.7, %v648_v63 }
 0x368   : > { %v657_v6 = vadd.f32 %v655_v3, %v653_v2  ;;  %v652_v7 = vsub.f32 1.0, %v650_v5  ;;  %v654_v9 = vmul.f32 %v650_v5, %v1436_v58 }
 0x36a   : > { %v663_v8 = vadd.f32 %v662_v4, %v657_v6  ;;  %v656_v10 = vmul.f32 %v652_v7, %v1438_v61 }
 0x36c   : > { %665 = vadd.xlane.f32.xlu1 %v663_v8  ;;  %v658_v11 = vadd.f32 %v656_v10, %v654_v9 }
 0x36e   : > { %v664_v12 = vadd.f32 %v662_v4, %v658_v11 }
 0x370   : > { %667 = vadd.xlane.f32.xlu1 %v664_v12 }
 0x3f9   : > { %v666_v13 = vpop.xlane.xlu1 %665 }
 0x3fa   : > { %v669_v14 = vmul.f32 0.0078125, %v666_v13 }
 0x3fc   : > { %v671_v15 = vsub.f32 %v663_v8, %v669_v14 }
 0x3fd   : > { %v668_v50 = vpop.xlane.xlu1 %667 }
 0x3fe   : > { %v670_v16 = vmul.f32 0.0078125, %v668_v50  ;;  %v673_v52 = vmul.f32 %v671_v15, %v671_v15 }
 0x400   : > { %v672_v17 = vsub.f32 %v664_v12, %v670_v16  ;;  %675 = vadd.xlane.f32.xlu1 %v673_v52 }
 0x402   : > { %v674_v18 = vmul.f32 %v672_v17, %v672_v17 }
 0x404   : > { %677 = vadd.xlane.f32.xlu1 %v674_v18 }
 0x48d   : > { %v676_v19 = vpop.xlane.xlu1 %675 }
 0x48e   : > { %v679_v20 = vmul.f32 0.0078125, %v676_v19 }
 0x490   : > { %v681_v58 = vadd.f32 1e-05, %v679_v20 }
 0x491   : > { %v678_v21 = vpop.xlane.xlu1 %677 }
 0x492   : > { %999 = vrsqrt.f32 %v681_v58  ;;  %v680_v61 = vmul.f32 0.0078125, %v678_v21 }
 0x494   : > { %v682_v22 = vadd.f32 1e-05, %v680_v61 }
 0x496   : > { %1001 = vrsqrt.f32 %v682_v22 }
 0x49c   : > { %v1000_v26 = vpop.eup %999 }
 0x49d   : > { %v685_v28 = vmul.f32 %v1000_v26, %v671_v15 }
 0x49f   : > { %v691_v29 = vmul.f32 %v690_v25, %v685_v28 }
 0x4a0   : > { %v1002_v30 = vpop.eup %1001 }
 0x4a1   : > { %v697_v31 = vadd.f32 %v696_v27, %v691_v29  ;;  %v686_v32 = vmul.f32 %v1002_v30, %v672_v17 }
 0x4a3   : > { %v692_v33 = vmul.f32 %v690_v25, %v686_v32  ;;  %699 = vst [vmem:[%s316_s12] sm:$0xff] %v697_v31 }
 0x4a5   : > { %v698_v42 = vadd.f32 %v696_v27, %v692_v33 }
 0x4a7   : > { %700 = vst [vmem:[%s316_s12 + $0x8] sm:$0xff] %v698_v42 }
 0x4a8   : > { %1102 = shalt.err (!%p1099_p9)
}
 0x4a9   : > { %s1103_s8 = scalar_lea.hbm %s1461_s28, 256  ;;  %s1107_s10 = scalar_lea.hbm %s1512_s6, 1024 }
 0x4aa   : > { %p1104_p12 = scmp.ne.s32.totalorder %s1461_s28, %s1103_s8  ;;  %p1108_p10 = scmp.lt.u32.totalorder %s1461_s28, %s1512_s6 }
 0x4ab   : > { %p1109_p1 = scmp.lt.u32.totalorder %s1107_s10, %s1103_s8  ;;  %p1111_p4 = scmp.lt.u32.totalorder %s1103_s8, %s1461_s28 }
 0x4ac   : > { %p1105_p0 = pnand %p1104_p12, %p1327_p6 }
 0x4ad   : > { %p1110_p2 = por %p1109_p1, %p1108_p10 }
 0x4ae   : > { %p1106_p5 = pneg %p1105_p0 }
 0x4af   : > { %p1112_p8 = por %p1111_p4, %p1110_p2 }
 0x4b1   : > { %p1113_p11 = pnand %p1112_p8, %p1106_p5 }
 0x4b3   : > { %1116 = shalt.err (!%p1113_p11)
}
 0x4b4   : > { %s1169_s12 = smov 128   ;;  %s1170_s13 = smov 8  }
 0x4b5   : > { %919 = dma.vmem_to_hbm [thread:$0]  (%p1327_p6), %s1463_s11, 256, %s1461_s28, %s702_s30, %s1169_s12, %s1169_s12, %s1170_s13  }
 0x4b6 PF: > { %p941_p13 = scmp.ge.s32.totalorder %s1159_s26, 2  ;;  %s730_s14 = sand.u32 1, %s1147_s23  }
 0x4b7   : > { %p1528_p3 = scmp.ne.s32.totalorder %s1517_s29, 0  ;;  %s731_s20 = scalar_lea.sflag [#allocation5], %s730_s14 }
 0x4b9   : > { %p933_p7 = pnand %p941_p13, %p1528_p3 }
 0x4bb   : > { %1142 = dma.done.wait (!%p933_p7), %s731_s20, 256  }
 0x4bc   : > { %1144 = vsyncadd (!%p933_p7), %s731_s20, 4294967040  ;;  %p21_p9 = scmp.ge.s32.totalorder %s1317_s9, 6   ;;  %s1529_s23 = smov %s1151_s24 }
 0x4bd   : > { %s1530_s24 = smov %s1155_s25  ;;  %s1531_s25 = smov %s1333_s7 }
 0x4be   : > { %s1532_s26 = smov %s1317_s9  ;;  %23 = sbr.rel (!%p21_p9) target bundleno = 8 (0x8), region = 100 }
 0x4c5   :  { %736 = vsyncpa [#allocation4], 1 }
 0x4c6   :  { %738 = vsyncpa [#allocation4 + $0x1], 1 }
 0x4c7   :  { %739 = vsyncpa [#allocation7], 1 }
 0x4c8   :  { %740 = vsyncpa [#allocation5], 1 }
 0x4c9   :  { %742 = vsyncpa [#allocation5 + $0x1], 1 }

</bundles_post_ra>
